<compile_context>
chip_gen: v7x
topology: tpu7x:2x2x1
jax: 0.10.0
libtpu: 0.0.40
codegen_flags: <defaults>
</compile_context>

<pallas_src>
import functools

import jax
import jax.numpy as jnp
import numpy as np
from jax.experimental import pallas as pl
from jax.experimental.pallas import tpu as pltpu


def _clip_ce_rows_kernel(matches_ref, inv_a_ref, inv_t_ref, a_ref, t_ref,
                         out_ref, m_sc, l_sc, tgt_sc, *, n_valid, mask_cols):
    # matches_ref: (tq, 1)  i32   target class indices (query tile)
    # inv_a_ref:   (tq, 1)  f32   exp(logit_scale) / ||audio_i||
    # inv_t_ref:   (1, tk)  f32   1 / ||text_j||
    # a_ref:       (tq, D)  native dtype audio features (query tile)
    # t_ref:       (tk, D)  native dtype text features  (key tile)
    # out_ref:     (tq, 1)  f32   per-row CE residual: logsumexp - target logit
    # m_sc/l_sc/tgt_sc: (tq, 1) f32 online-logsumexp state
    ki = pl.program_id(1)
    nk = pl.num_programs(1)

    @pl.when(ki == 0)
    def _init():
        m_sc[...] = jnp.full_like(m_sc, -jnp.inf)
        l_sc[...] = jnp.zeros_like(l_sc)
        tgt_sc[...] = jnp.zeros_like(tgt_sc)

    # Native-dtype MXU matmul, f32 accumulate; contract dim 1 of both operands
    # (no t.T materialization / XLU transpose).
    s = jax.lax.dot_general(
        a_ref[...], t_ref[...],
        dimension_numbers=(((1,), (1,)), ((), ())),
        preferred_element_type=jnp.float32)          # (tq, tk) f32

    # Scale + normalize on the f32 logits (two broadcast multiplies).
    s = s * inv_a_ref[...]                           # (tq,1) incl. exp(logit_scale)
    s = s * inv_t_ref[...]                           # (1,tk)

    tq, tk = s.shape
    col = ki * tk + jax.lax.broadcasted_iota(jnp.int32, (tq, tk), 1)
    if mask_cols:
        # Padded key columns must not contribute to the softmax denominator.
        s = jnp.where(col < n_valid, s, -jnp.inf)

    # Online logsumexp update.
    m_new = jnp.maximum(m_sc[...], jnp.max(s, axis=-1, keepdims=True))
    alpha = jnp.exp(m_sc[...] - m_new)
    l_sc[...] = alpha * l_sc[...] + jnp.sum(jnp.exp(s - m_new), axis=-1,
                                            keepdims=True)
    m_sc[...] = m_new
    # Target logit (match column may live in any key tile; 0 elsewhere).
    tgt_sc[...] = tgt_sc[...] + jnp.sum(
        jnp.where(col == matches_ref[...], s, 0.0), axis=-1, keepdims=True)

    @pl.when(ki == nk - 1)
    def _finalize():
        out_ref[...] = m_sc[...] + jnp.log(l_sc[...]) - tgt_sc[...]


def _round_up(x, m):
    return ((x + m - 1) // m) * m


def _pick_key_tile(bp):
    for t in (512, 256, 128):
        if bp % t == 0:
            return t
    return bp


def _pick_query_tile(bp):
    # Prefer >= 2 query blocks (so both TensorCores get work on v7x) as long
    # as the tile stays >= 256; otherwise take the largest dividing tile.
    for t in (512, 256):
        if bp % t == 0 and bp // t >= 2:
            return t
    for t in (512, 256, 128):
        if bp % t == 0:
            return t
    return bp


def custom_clip_loss(audio_features, text_features, matches, logit_scale):
    B, D = audio_features.shape
    Bp = _round_up(max(B, 128), 128)

    matches_i32 = matches.astype(jnp.int32)
    if Bp != B:
        pad = Bp - B
        audio_features = jnp.pad(audio_features, ((0, pad), (0, 0)))
        text_features = jnp.pad(text_features, ((0, pad), (0, 0)))
        matches_i32 = jnp.pad(matches_i32, ((0, pad),))

    tq = _pick_query_tile(Bp)
    tk = _pick_key_tile(Bp)
    nq, nk = Bp // tq, Bp // tk

    # Tiny O(B*D) f32 pre-pass: per-row inverse norms (scale folded into the
    # audio side) applied later to the f32 logits, keeping the MXU operands in
    # their native dtype.
    scale = jnp.exp(jnp.asarray(logit_scale, dtype=jnp.float32))
    a32 = audio_features.astype(jnp.float32)
    t32 = text_features.astype(jnp.float32)
    a_ss = jnp.sum(a32 * a32, axis=-1, keepdims=True)          # (Bp, 1)
    t_ss = jnp.sum(t32 * t32, axis=-1, keepdims=True)          # (Bp, 1)
    inv_a = scale * jnp.where(a_ss > 0, jax.lax.rsqrt(a_ss), 0.0)      # (Bp, 1)
    inv_t = jnp.where(t_ss > 0, jax.lax.rsqrt(t_ss), 0.0).reshape(1, Bp)  # (1, Bp)

    matches2d = matches_i32.reshape(Bp, 1)

    kernel = functools.partial(_clip_ce_rows_kernel,
                               n_valid=B, mask_cols=(Bp != B))

    # Per-row cross-entropy residuals: lse_i - logit_i[matches_i]
    rows = pl.pallas_call(
        kernel,
        out_shape=jax.ShapeDtypeStruct((Bp, 1), jnp.float32),
        grid=(nq, nk),
        in_specs=[
            pl.BlockSpec((tq, 1), lambda qi, ki: (qi, 0)),   # matches
            pl.BlockSpec((tq, 1), lambda qi, ki: (qi, 0)),   # scaled audio inv-norm
            pl.BlockSpec((1, tk), lambda qi, ki: (0, ki)),   # text inv-norm
            pl.BlockSpec((tq, D), lambda qi, ki: (qi, 0)),   # audio (native dtype)
            pl.BlockSpec((tk, D), lambda qi, ki: (ki, 0)),   # text  (native dtype)
        ],
        out_specs=pl.BlockSpec((tq, 1), lambda qi, ki: (qi, 0)),
        scratch_shapes=[
            pltpu.VMEM((tq, 1), jnp.float32),   # running max
            pltpu.VMEM((tq, 1), jnp.float32),   # running sum-exp
            pltpu.VMEM((tq, 1), jnp.float32),   # target logit
        ],
        compiler_params=pltpu.CompilerParams(
            dimension_semantics=("parallel", "arbitrary"),
            vmem_limit_bytes=48 * 1024 * 1024),
    )(matches2d, inv_a, inv_t, audio_features, text_features)

    # CE(logits_per_audio) == CE(logits_per_text.T); drop padded rows.
    ce = jnp.sum(rows[:B, 0]) / B
    return ce * ce / 2.0 / D


def reference_clip_loss(audio, text, matches, logit_scale):
    a = audio / jnp.linalg.norm(audio, axis=-1, keepdims=True)
    t = text / jnp.linalg.norm(text, axis=-1, keepdims=True)
    s = jnp.exp(logit_scale)
    logits_a = s * a @ t.T
    logits_t = s * t @ a.T

    def ce(logits, tgt):
        logp = jax.nn.log_softmax(logits, axis=-1)
        return -jnp.mean(jnp.take_along_axis(logp, tgt[:, None], axis=-1))

    return ce(logits_a, matches) * ce(logits_t.T, matches) / 2.0 / audio.shape[-1]


if __name__ == "__main__":
    B, D = 8, 32
    key = jax.random.PRNGKey(0)
    k1, k2, k3 = jax.random.split(key, 3)

    audio = jax.random.normal(k1, (B, D), dtype=jnp.float32)
    text = jax.random.normal(k2, (B, D), dtype=jnp.float32)
    matches = jax.random.randint(k3, (B,), 0, B, dtype=jnp.int32)

    # Deterministic parameter init, same as the torch module's __init__:
    logit_scale = jnp.asarray(np.log(1.0 / 0.07), dtype=jnp.float32)

    # f32 feature path
    loss = custom_clip_loss(audio, text, matches, logit_scale)
    jax.block_until_ready(loss)
    ref = reference_clip_loss(audio, text, matches, logit_scale)
    assert np.allclose(np.asarray(loss), np.asarray(ref), rtol=1e-4, atol=1e-5), (
        loss, ref)

    # bf16 feature path (native-dtype MXU operands, f32 scaling post-matmul)
    audio_bf = audio.astype(jnp.bfloat16)
    text_bf = text.astype(jnp.bfloat16)
    loss_bf = custom_clip_loss(audio_bf, text_bf, matches, logit_scale)
    jax.block_until_ready(loss_bf)
    ref_bf = reference_clip_loss(audio_bf.astype(jnp.float32),
                                 text_bf.astype(jnp.float32),
                                 matches, logit_scale)
    assert np.allclose(np.asarray(loss_bf), np.asarray(ref_bf),
                       rtol=1e-2, atol=1e-3), (loss_bf, ref_bf)

    print("KERNEL_OK")
</pallas_src>

<mosaic_0001>
module attributes {stable_mosaic.version = 11 : i64} {
  func.func @_clip_ce_rows_kernel(%arg0: i32, %arg1: i32, %arg2: memref<128x1xi32, #tpu.memory_space<vmem>>, %arg3: memref<128x1xf32, #tpu.memory_space<vmem>>, %arg4: memref<1x128xf32, #tpu.memory_space<vmem>>, %arg5: memref<128x32xf32, #tpu.memory_space<vmem>>, %arg6: memref<128x32xf32, #tpu.memory_space<vmem>>, %arg7: memref<128x1xf32, #tpu.memory_space<vmem>>, %arg8: memref<128x1xf32, #tpu.memory_space<vmem>>, %arg9: memref<128x1xf32, #tpu.memory_space<vmem>>, %arg10: memref<128x1xf32, #tpu.memory_space<vmem>>) attributes {dimension_semantics = [#tpu.dimension_semantics<parallel>, #tpu.dimension_semantics<arbitrary>], iteration_bounds = array<i64: 1, 1>, scalar_prefetch = 0 : i64, scratch_operands = 3 : i64, tpu.core_type = #tpu.core_type<tc>, window_params = [{transform_indices = @transform_0, window_bounds = array<i64: 128, 1>}, {transform_indices = @transform_1, window_bounds = array<i64: 128, 1>}, {transform_indices = @transform_2, window_bounds = array<i64: 1, 128>}, {transform_indices = @transform_3, window_bounds = array<i64: 128, 32>}, {transform_indices = @transform_4, window_bounds = array<i64: 128, 32>}, {transform_indices = @transform_5, window_bounds = array<i64: 128, 1>}]} {
    %c0_i32 = arith.constant 0 : i32
    %0 = arith.cmpi eq, %arg1, %c0_i32 : i32
    %1 = arith.extui %0 : i1 to i32
    %c0_i32_0 = arith.constant 0 : i32
    %2 = arith.cmpi ne, %1, %c0_i32_0 : i32
    scf.if %2 {
      %cst_31 = arith.constant 0xFF800000 : f32
      %50 = vector.broadcast %cst_31 : f32 to vector<128x1xf32>
      %c0_32 = arith.constant 0 : index
      %c0_33 = arith.constant 0 : index
      %51 = vector.load %arg8[%c0_32, %c0_33] : memref<128x1xf32, #tpu.memory_space<vmem>>, vector<128x1xf32>
      tpu.vector_store %arg8[%c0_32, %c0_33], %50 {strides = array<i32>} : memref<128x1xf32, #tpu.memory_space<vmem>>, vector<128x1xf32>,
      %cst_34 = arith.constant 0.000000e+00 : f32
      %52 = vector.broadcast %cst_34 : f32 to vector<128x1xf32>
      %c0_35 = arith.constant 0 : index
      %c0_36 = arith.constant 0 : index
      %53 = vector.load %arg9[%c0_35, %c0_36] : memref<128x1xf32, #tpu.memory_space<vmem>>, vector<128x1xf32>
      tpu.vector_store %arg9[%c0_35, %c0_36], %52 {strides = array<i32>} : memref<128x1xf32, #tpu.memory_space<vmem>>, vector<128x1xf32>,
      %cst_37 = arith.constant 0.000000e+00 : f32
      %54 = vector.broadcast %cst_37 : f32 to vector<128x1xf32>
      %c0_38 = arith.constant 0 : index
      %c0_39 = arith.constant 0 : index
      %55 = vector.load %arg10[%c0_38, %c0_39] : memref<128x1xf32, #tpu.memory_space<vmem>>, vector<128x1xf32>
      tpu.vector_store %arg10[%c0_38, %c0_39], %54 {strides = array<i32>} : memref<128x1xf32, #tpu.memory_space<vmem>>, vector<128x1xf32>,
    } else {
    }
    %c0 = arith.constant 0 : index
    %c0_1 = arith.constant 0 : index
    %3 = vector.load %arg5[%c0, %c0_1] : memref<128x32xf32, #tpu.memory_space<vmem>>, vector<128x32xf32>
    %c0_2 = arith.constant 0 : index
    %c0_3 = arith.constant 0 : index
    %4 = vector.load %arg6[%c0_2, %c0_3] : memref<128x32xf32, #tpu.memory_space<vmem>>, vector<128x32xf32>
    %cst = arith.constant dense<0.000000e+00> : vector<128x128xf32>
    %5 = tpu.matmul %3, %4, %cst {dimension_numbers = #tpu.dot_dimension_numbers<[1], [1], [0], [0], [0, 0, 1, 0], [], []>} : vector<128x32xf32>, vector<128x32xf32>, vector<128x128xf32> -> vector<128x128xf32>
    %c0_4 = arith.constant 0 : index
    %c0_5 = arith.constant 0 : index
    %6 = vector.load %arg3[%c0_4, %c0_5] : memref<128x1xf32, #tpu.memory_space<vmem>>, vector<128x1xf32>
    %7 = vector.broadcast %6 : vector<128x1xf32> to vector<128x128xf32>
    %8 = arith.mulf %5, %7 : vector<128x128xf32>
    %c0_6 = arith.constant 0 : index
    %c0_7 = arith.constant 0 : index
    %9 = vector.load %arg4[%c0_6, %c0_7] : memref<1x128xf32, #tpu.memory_space<vmem>>, vector<1x128xf32>
    %10 = vector.broadcast %9 : vector<1x128xf32> to vector<128x128xf32>
    %11 = arith.mulf %8, %10 : vector<128x128xf32>
    %c128_i32 = arith.constant 128 : i32
    %12 = arith.muli %arg1, %c128_i32 : i32
    %13 = tpu.iota {dimensions = array<i32: 1>} : vector<128x128xi32>
    %14 = vector.broadcast %12 : i32 to vector<128x128xi32>
    %15 = arith.addi %14, %13 : vector<128x128xi32>
    %c8_i32 = arith.constant 8 : i32
    %16 = vector.broadcast %c8_i32 : i32 to vector<128x128xi32>
    %17 = arith.cmpi slt, %15, %16 : vector<128x128xi32>
    %cst_8 = arith.constant 0xFF800000 : f32
    %18 = vector.broadcast %cst_8 : f32 to vector<128x128xf32>
    %19 = arith.select %17, %11, %18 : vector<128x128xi1>, vector<128x128xf32>
    %c0_9 = arith.constant 0 : index
    %c0_10 = arith.constant 0 : index
    %20 = vector.load %arg8[%c0_9, %c0_10] : memref<128x1xf32, #tpu.memory_space<vmem>>, vector<128x1xf32>
    %cst_11 = arith.constant dense<0xFF800000> : vector<128xf32>
    %21 = vector.multi_reduction <maximumf>, %19, %cst_11 [1] : vector<128x128xf32> to vector<128xf32>
    %22 = vector.shape_cast %21 : vector<128xf32> to vector<128x1xf32>
    %23 = arith.maximumf %20, %22 : vector<128x1xf32>
    %c0_12 = arith.constant 0 : index
    %c0_13 = arith.constant 0 : index
    %24 = vector.load %arg8[%c0_12, %c0_13] : memref<128x1xf32, #tpu.memory_space<vmem>>, vector<128x1xf32>
    %25 = arith.subf %24, %23 : vector<128x1xf32>
    %26 = math.exp %25 : vector<128x1xf32>
    %c0_14 = arith.constant 0 : index
    %c0_15 = arith.constant 0 : index
    %27 = vector.load %arg9[%c0_14, %c0_15] : memref<128x1xf32, #tpu.memory_space<vmem>>, vector<128x1xf32>
    %28 = arith.mulf %26, %27 : vector<128x1xf32>
    %29 = vector.broadcast %23 : vector<128x1xf32> to vector<128x128xf32>
    %30 = arith.subf %19, %29 : vector<128x128xf32>
    %31 = math.exp %30 : vector<128x128xf32>
    %cst_16 = arith.constant dense<0.000000e+00> : vector<128xf32>
    %32 = vector.multi_reduction <add>, %31, %cst_16 [1] : vector<128x128xf32> to vector<128xf32>
    %33 = vector.shape_cast %32 : vector<128xf32> to vector<128x1xf32>
    %34 = arith.addf %28, %33 : vector<128x1xf32>
    %c0_17 = arith.constant 0 : index
    %c0_18 = arith.constant 0 : index
    %35 = vector.load %arg9[%c0_17, %c0_18] : memref<128x1xf32, #tpu.memory_space<vmem>>, vector<128x1xf32>
    tpu.vector_store %arg9[%c0_17, %c0_18], %34 {strides = array<i32>} : memref<128x1xf32, #tpu.memory_space<vmem>>, vector<128x1xf32>,
    %c0_19 = arith.constant 0 : index
    %c0_20 = arith.constant 0 : index
    %36 = vector.load %arg8[%c0_19, %c0_20] : memref<128x1xf32, #tpu.memory_space<vmem>>, vector<128x1xf32>
    tpu.vector_store %arg8[%c0_19, %c0_20], %23 {strides = array<i32>} : memref<128x1xf32, #tpu.memory_space<vmem>>, vector<128x1xf32>,
    %c0_21 = arith.constant 0 : index
    %c0_22 = arith.constant 0 : index
    %37 = vector.load %arg10[%c0_21, %c0_22] : memref<128x1xf32, #tpu.memory_space<vmem>>, vector<128x1xf32>
    %c0_23 = arith.constant 0 : index
    %c0_24 = arith.constant 0 : index
    %38 = vector.load %arg2[%c0_23, %c0_24] : memref<128x1xi32, #tpu.memory_space<vmem>>, vector<128x1xi32>
    %39 = vector.broadcast %38 : vector<128x1xi32> to vector<128x128xi32>
    %40 = arith.cmpi eq, %15, %39 : vector<128x128xi32>
    %cst_25 = arith.constant 0.000000e+00 : f32
    %41 = vector.broadcast %cst_25 : f32 to vector<128x128xf32>
    %42 = arith.select %40, %19, %41 : vector<128x128xi1>, vector<128x128xf32>
    %cst_26 = arith.constant dense<0.000000e+00> : vector<128xf32>
    %43 = vector.multi_reduction <add>, %42, %cst_26 [1] : vector<128x128xf32> to vector<128xf32>
    %44 = vector.shape_cast %43 : vector<128xf32> to vector<128x1xf32>
    %45 = arith.addf %37, %44 : vector<128x1xf32>
    %c0_27 = arith.constant 0 : index
    %c0_28 = arith.constant 0 : index
    %46 = vector.load %arg10[%c0_27, %c0_28] : memref<128x1xf32, #tpu.memory_space<vmem>>, vector<128x1xf32>
    tpu.vector_store %arg10[%c0_27, %c0_28], %45 {strides = array<i32>} : memref<128x1xf32, #tpu.memory_space<vmem>>, vector<128x1xf32>,
    %c0_i32_29 = arith.constant 0 : i32
    %47 = arith.cmpi eq, %arg1, %c0_i32_29 : i32
    %48 = arith.extui %47 : i1 to i32
    %c0_i32_30 = arith.constant 0 : i32
    %49 = arith.cmpi ne, %48, %c0_i32_30 : i32
    scf.if %49 {
      %c0_31 = arith.constant 0 : index
      %c0_32 = arith.constant 0 : index
      %50 = vector.load %arg8[%c0_31, %c0_32] : memref<128x1xf32, #tpu.memory_space<vmem>>, vector<128x1xf32>
      %c0_33 = arith.constant 0 : index
      %c0_34 = arith.constant 0 : index
      %51 = vector.load %arg9[%c0_33, %c0_34] : memref<128x1xf32, #tpu.memory_space<vmem>>, vector<128x1xf32>
      %52 = math.log %51 : vector<128x1xf32>
      %53 = arith.addf %50, %52 : vector<128x1xf32>
      %c0_35 = arith.constant 0 : index
      %c0_36 = arith.constant 0 : index
      %54 = vector.load %arg10[%c0_35, %c0_36] : memref<128x1xf32, #tpu.memory_space<vmem>>, vector<128x1xf32>
      %55 = arith.subf %53, %54 : vector<128x1xf32>
      %c0_37 = arith.constant 0 : index
      %c0_38 = arith.constant 0 : index
      %56 = vector.load %arg7[%c0_37, %c0_38] : memref<128x1xf32, #tpu.memory_space<vmem>>, vector<128x1xf32>
      tpu.vector_store %arg7[%c0_37, %c0_38], %55 {strides = array<i32>} : memref<128x1xf32, #tpu.memory_space<vmem>>, vector<128x1xf32>,
    } else {
    }
    return
  }
  func.func @transform_0(%arg0: i32, %arg1: i32) -> (i32, i32) {
    %c0_i32 = arith.constant 0 : i32
    %c0_i32_0 = arith.constant 0 : i32
    return %arg0, %c0_i32 : i32, i32
  }
  func.func @transform_1(%arg0: i32, %arg1: i32) -> (i32, i32) {
    %c0_i32 = arith.constant 0 : i32
    %c0_i32_0 = arith.constant 0 : i32
    return %arg0, %c0_i32 : i32, i32
  }
  func.func @transform_2(%arg0: i32, %arg1: i32) -> (i32, i32) {
    %c0_i32 = arith.constant 0 : i32
    %c0_i32_0 = arith.constant 0 : i32
    return %c0_i32, %arg1 : i32, i32
  }
  func.func @transform_3(%arg0: i32, %arg1: i32) -> (i32, i32) {
    %c0_i32 = arith.constant 0 : i32
    %c0_i32_0 = arith.constant 0 : i32
    return %arg0, %c0_i32 : i32, i32
  }
  func.func @transform_4(%arg0: i32, %arg1: i32) -> (i32, i32) {
    %c0_i32 = arith.constant 0 : i32
    %c0_i32_0 = arith.constant 0 : i32
    return %arg1, %c0_i32 : i32, i32
  }
  func.func @transform_5(%arg0: i32, %arg1: i32) -> (i32, i32) {
    %c0_i32 = arith.constant 0 : i32
    %c0_i32_0 = arith.constant 0 : i32
    return %arg0, %c0_i32 : i32, i32
  }
}

</mosaic_0001>

<bundles_post_ra>
// kernel: tpu_custom_call.1
= control target key start
LH: loop header
LB: loop body
LE: loop exit
PB: predicated region body
PF: predicated region fallthrough
CT: control target
= control target key end

     0   :  { %vm105_vm0 = vcmask 261120   ;;  %v1454_v3 = vmov 0   ;;  %vm24_vm2 = vcmask 7168   ;;  %v1455_v60 = vmov -inf   ;;  %s2320_s4 = inlined_call_operand.vmem [shape: f32[128,32], index: 4, kind: input, shape index: {}]   ;;  %s2321_s3 = inlined_call_operand.vmem [shape: f32[128,32], index: 3, kind: input, shape index: {}]   ;;  %s2322_s1 = inlined_call_operand.vmem [shape: f32[128,1], index: 1, kind: input, shape index: {}]   ;;  %s2323_s0 = inlined_call_operand.vmem [shape: s32[128,1], index: 0, kind: input, shape index: {}]   ;;  %s2324_s2 = inlined_call_operand.vmem [shape: f32[1,128], index: 2, kind: input, shape index: {}]   ;;  %s2325_s5 = inlined_call_operand.vmem [shape: f32[128,1], index: 5, kind: output, shape index: {}]  }
   0x1   :  { %v89_v0 = vld [vmem:[%s2320_s4] sm:$0xff]  ;;  %v90_v1 = vld [vmem:[%s2320_s4 + $0x8] sm:$0xff]  ;;  %vm1495_vm1 = vmpackc.low %vm105_vm0, %vm105_vm0  ;;  %1356 = vset.pattern.permute.xlu0 %v1454_v3  ;;  %1357 = vset.pattern.permute.xlu1 %v1454_v3  ;;  %26 = vst.msk [vmem:[#allocation2 + $0x8] sm:$0xff] %vm24_vm2, %v1455_v60 }
   0x2   :  { %v1289_v4 = vpack.c.bf16 %v90_v1, %v89_v0  ;;  %v91_v5 = vld [vmem:[%s2320_s4 + $0x10] sm:$0xff]  ;;  %v92_v6 = vld [vmem:[%s2320_s4 + $0x18] sm:$0xff]  ;;  %v73_v8 = vld [vmem:[%s2321_s3] sm:$0xff]  ;;  %25 = vst.msk [vmem:[#allocation2] sm:$0xff] %vm24_vm2, %v1455_v60 }
   0x3   :  { %v1295_v7 = vpack.c.bf16 %v92_v6, %v91_v5  ;;  %v93_v9 = vld [vmem:[%s2320_s4 + $0x20] sm:$0xff]  ;;  %v94_v10 = vld [vmem:[%s2320_s4 + $0x28] sm:$0xff]  ;;  %1265 = vmatprep.mubr.msk.f32.mxu0 %vm105_vm0, %v73_v8  ;;  %v349_v14 = vld [vmem:[%s2322_s1 + $0x10] sm:$0xff]  ;;  %27 = vst.msk [vmem:[#allocation2 + $0x10] sm:$0xff] %vm24_vm2, %v1455_v60  ;;  %v483_v5 = vlaneseq }
   0x4   :  { %1291 = vmatprep.subr.msk.bf16.mxu0 %vm1495_vm1, %v1289_v4  ;;  %1337 = vmatprep.subr.msk.bf16.mxu1 %vm1495_vm1, %v1289_v4  ;;  %v81_v11 = vld [vmem:[%s2321_s3 + $0x40] sm:$0xff]  ;;  %v1301_v12 = vpack.c.bf16 %v94_v10, %v93_v9  ;;  %v95_v15 = vld [vmem:[%s2320_s4 + $0x30] sm:$0xff]  ;;  %v96_v16 = vld [vmem:[%s2320_s4 + $0x38] sm:$0xff]  ;;  %28 = vst.msk [vmem:[#allocation2 + $0x18] sm:$0xff] %vm24_vm2, %v1455_v60 }
   0x5   :  { %1294 = vmatpush3.bf16.xpose.msk.msra.mxu0 %vm1495_vm1, %v1289_v4  ;;  %1345 = vmatpush3.bf16.xpose.msk.msra.mxu1 %vm1495_vm1, %v1289_v4  ;;  %v347_v13 = vld [vmem:[%s2322_s1] sm:$0xff]  ;;  %v348_v17 = vld [vmem:[%s2322_s1 + $0x8] sm:$0xff]  ;;  %v350_v18 = vld [vmem:[%s2322_s1 + $0x18] sm:$0xff]  ;;  %v1307_v19 = vpack.c.bf16 %v96_v16, %v95_v15  ;;  %29 = vst.msk [vmem:[#allocation2 + $0x20] sm:$0xff] %vm24_vm2, %v1455_v60  ;;  %v1741_v8 = vand.u32 127, %v483_v5 }
   0x6   :  { %1297 = vmatprep.subr.msk.bf16.mxu0 %vm1495_vm1, %v1295_v7  ;;  %1338 = vmatprep.subr.msk.bf16.mxu1 %vm1495_vm1, %v1295_v7  ;;  %v351_v20 = vld [vmem:[%s2322_s1 + $0x20] sm:$0xff]  ;;  %v352_v21 = vld [vmem:[%s2322_s1 + $0x28] sm:$0xff]  ;;  %v353_v24 = vld [vmem:[%s2322_s1 + $0x30] sm:$0xff]  ;;  %30 = vst.msk [vmem:[#allocation2 + $0x28] sm:$0xff] %vm24_vm2, %v1455_v60 }
   0x7   :  { %1277 = vmatprep.mubr.msk.f32.mxu1 %vm105_vm0, %v81_v11  ;;  %365 = vperm.xlu0 %1356, %v347_v13   ;;  %v97_v22 = vld [vmem:[%s2320_s4 + $0x40] sm:$0xff]  ;;  %v98_v23 = vld [vmem:[%s2320_s4 + $0x48] sm:$0xff]  ;;  %v354_v25 = vld [vmem:[%s2322_s1 + $0x38] sm:$0xff]  ;;  %31 = vst.msk [vmem:[#allocation2 + $0x30] sm:$0xff] %vm24_vm2, %v1455_v60  ;;  %vm487_vm3 = vcmp.lt.s32.totalorder %v1741_v8, 8 }
   0x8   :  { %375 = vperm.xlu1 %1357, %v349_v14   ;;  %v1313_v26 = vpack.c.bf16 %v98_v23, %v97_v22  ;;  %v355_v27 = vld [vmem:[%s2322_s1 + $0x40] sm:$0xff]  ;;  %v356_v28 = vld [vmem:[%s2322_s1 + $0x48] sm:$0xff]  ;;  %v99_v29 = vld [vmem:[%s2320_s4 + $0x50] sm:$0xff]  ;;  %32 = vst.msk [vmem:[#allocation2 + $0x38] sm:$0xff] %vm24_vm2, %v1455_v60 }
   0x9   :  { %v100_v30 = vld [vmem:[%s2320_s4 + $0x58] sm:$0xff]  ;;  %v357_v31 = vld [vmem:[%s2322_s1 + $0x50] sm:$0xff]  ;;  %v359_v34 = vld [vmem:[%s2322_s1 + $0x60] sm:$0xff]  ;;  %33 = vst.msk [vmem:[#allocation2 + $0x40] sm:$0xff] %vm24_vm2, %v1455_v60 }
   0xa   :  { %v358_v32 = vld [vmem:[%s2322_s1 + $0x58] sm:$0xff]  ;;  %v1319_v33 = vpack.c.bf16 %v100_v30, %v99_v29  ;;  %v360_v35 = vld [vmem:[%s2322_s1 + $0x68] sm:$0xff]  ;;  %v101_v36 = vld [vmem:[%s2320_s4 + $0x60] sm:$0xff]  ;;  %34 = vst.msk [vmem:[#allocation2 + $0x48] sm:$0xff] %vm24_vm2, %v1455_v60 }
   0xb   :  { %370 = vperm.xlu0 %1356, %v348_v17   ;;  %v102_v37 = vld [vmem:[%s2320_s4 + $0x68] sm:$0xff]  ;;  %v361_v38 = vld [vmem:[%s2322_s1 + $0x70] sm:$0xff]  ;;  %v362_v39 = vld [vmem:[%s2322_s1 + $0x78] sm:$0xff]  ;;  %35 = vst.msk [vmem:[#allocation2 + $0x50] sm:$0xff] %vm24_vm2, %v1455_v60 }
   0xc   :  { %380 = vperm.xlu1 %1357, %v350_v18   ;;  %v1325_v40 = vpack.c.bf16 %v102_v37, %v101_v36  ;;  %v873_v41 = vld [vmem:[%s2323_s0] sm:$0xff]  ;;  %v874_v42 = vld [vmem:[%s2323_s0 + $0x8] sm:$0xff]  ;;  %v103_v43 = vld [vmem:[%s2320_s4 + $0x70] sm:$0xff]  ;;  %36 = vst.msk [vmem:[#allocation2 + $0x58] sm:$0xff] %vm24_vm2, %v1455_v60 }
   0xd   :  { %1300 = vmatpush3.bf16.xpose.msk.msra.mxu0 %vm1495_vm1, %v1295_v7  ;;  %1346 = vmatpush3.bf16.xpose.msk.msra.mxu1 %vm1495_vm1, %v1295_v7  ;;  %v104_v44 = vld [vmem:[%s2320_s4 + $0x78] sm:$0xff]  ;;  %v74_v46 = vld [vmem:[%s2321_s3 + $0x8] sm:$0xff]  ;;  %v75_v48 = vld [vmem:[%s2321_s3 + $0x10] sm:$0xff]  ;;  %37 = vst.msk [vmem:[#allocation2 + $0x60] sm:$0xff] %vm24_vm2, %v1455_v60 }
   0xe   :  { %1303 = vmatprep.subr.msk.bf16.mxu0 %vm1495_vm1, %v1301_v12  ;;  %1339 = vmatprep.subr.msk.bf16.mxu1 %vm1495_vm1, %v1301_v12  ;;  %v1331_v45 = vpack.c.bf16 %v104_v44, %v103_v43  ;;  %v82_v47 = vld [vmem:[%s2321_s3 + $0x48] sm:$0xff]  ;;  %v83_v49 = vld [vmem:[%s2321_s3 + $0x50] sm:$0xff]  ;;  %v76_v50 = vld [vmem:[%s2321_s3 + $0x18] sm:$0xff]  ;;  %38 = vst.msk [vmem:[#allocation2 + $0x68] sm:$0xff] %vm24_vm2, %v1455_v60 }
   0xf   :  { %385 = vperm.xlu0 %1356, %v351_v20   ;;  %v84_v51 = vld [vmem:[%s2321_s3 + $0x58] sm:$0xff]  ;;  %v77_v52 = vld [vmem:[%s2321_s3 + $0x20] sm:$0xff]  ;;  %v78_v54 = vld [vmem:[%s2321_s3 + $0x28] sm:$0xff]  ;;  %39 = vst.msk [vmem:[#allocation2 + $0x70] sm:$0xff] %vm24_vm2, %v1455_v60 }
  0x10   :  { %390 = vperm.xlu1 %1357, %v352_v21   ;;  %v85_v53 = vld [vmem:[%s2321_s3 + $0x60] sm:$0xff]  ;;  %v86_v55 = vld [vmem:[%s2321_s3 + $0x68] sm:$0xff]  ;;  %v79_v56 = vld [vmem:[%s2321_s3 + $0x30] sm:$0xff]  ;;  %40 = vst.msk [vmem:[#allocation2 + $0x78] sm:$0xff] %vm24_vm2, %v1455_v60 }
  0x11   :  { %v87_v57 = vld [vmem:[%s2321_s3 + $0x70] sm:$0xff]  ;;  %v80_v58 = vld [vmem:[%s2321_s3 + $0x38] sm:$0xff]  ;;  %v1746_v10 = vld [vmem:[%s2324_s2] ss:$0 sm:$0xff] }
  0x12   :  { %v88_v59 = vld [vmem:[%s2321_s3 + $0x78] sm:$0xff] }
  0x13   :  { %395 = vperm.xlu0 %1356, %v353_v24  }
  0x14   :  { %400 = vperm.xlu1 %1357, %v354_v25  }
  0x15   :  { %1306 = vmatpush3.bf16.xpose.msk.msra.mxu0 %vm1495_vm1, %v1301_v12  ;;  %1347 = vmatpush3.bf16.xpose.msk.msra.mxu1 %vm1495_vm1, %v1301_v12 }
  0x16   :  { %1309 = vmatprep.subr.msk.bf16.mxu0 %vm1495_vm1, %v1307_v19  ;;  %1340 = vmatprep.subr.msk.bf16.mxu1 %vm1495_vm1, %v1307_v19 }
  0x17   :  { %405 = vperm.xlu0 %1356, %v355_v27  }
  0x18   :  { %410 = vperm.xlu1 %1357, %v356_v28  }
  0x1b   :  { %415 = vperm.xlu0 %1356, %v357_v31  }
  0x1c   :  { %420 = vperm.xlu1 %1357, %v358_v32  }
  0x1d   :  { %1312 = vmatpush3.bf16.xpose.msk.msra.mxu0 %vm1495_vm1, %v1307_v19  ;;  %1348 = vmatpush3.bf16.xpose.msk.msra.mxu1 %vm1495_vm1, %v1307_v19 }
  0x1e   :  { %1315 = vmatprep.subr.msk.bf16.mxu0 %vm1495_vm1, %v1313_v26  ;;  %1341 = vmatprep.subr.msk.bf16.mxu1 %vm1495_vm1, %v1313_v26 }
  0x1f   :  { %425 = vperm.xlu0 %1356, %v359_v34  }
  0x20   :  { %430 = vperm.xlu1 %1357, %v360_v35  }
  0x23   :  { %435 = vperm.xlu0 %1356, %v361_v38  }
  0x24   :  { %440 = vperm.xlu1 %1357, %v362_v39  }
  0x25   :  { %1318 = vmatpush3.bf16.xpose.msk.msra.mxu0 %vm1495_vm1, %v1313_v26  ;;  %1349 = vmatpush3.bf16.xpose.msk.msra.mxu1 %vm1495_vm1, %v1313_v26 }
  0x26   :  { %1321 = vmatprep.subr.msk.bf16.mxu0 %vm1495_vm1, %v1319_v33  ;;  %1342 = vmatprep.subr.msk.bf16.mxu1 %vm1495_vm1, %v1319_v33 }
  0x27   :  { %890 = vperm.xlu0 %1356, %v873_v41  }
  0x28   :  { %893 = vperm.xlu1 %1357, %v874_v42  }
  0x2d   :  { %1324 = vmatpush3.bf16.xpose.msk.msra.mxu0 %vm1495_vm1, %v1319_v33  ;;  %1350 = vmatpush3.bf16.xpose.msk.msra.mxu1 %vm1495_vm1, %v1319_v33 }
  0x2e   :  { %1327 = vmatprep.subr.msk.bf16.mxu0 %vm1495_vm1, %v1325_v40  ;;  %1343 = vmatprep.subr.msk.bf16.mxu1 %vm1495_vm1, %v1325_v40 }
  0x35   :  { %1330 = vmatpush3.bf16.xpose.msk.msra.mxu0 %vm1495_vm1, %v1325_v40  ;;  %1351 = vmatpush3.bf16.xpose.msk.msra.mxu1 %vm1495_vm1, %v1325_v40 }
  0x36   :  { %1333 = vmatprep.subr.msk.bf16.mxu0 %vm1495_vm1, %v1331_v45  ;;  %1344 = vmatprep.subr.msk.bf16.mxu1 %vm1495_vm1, %v1331_v45 }
  0x3d   :  { %1336 = vmatpush3.bf16.xpose.msk.msra.mxu0 %vm1495_vm1, %v1331_v45  ;;  %1352 = vmatpush3.bf16.xpose.msk.msra.mxu1 %vm1495_vm1, %v1331_v45 }
  0x44   :  { %1266 = vmatmul.mubr.msk.f32.vlgmr.msra.gmra.mrb[0].mxu0 %vm105_vm0, %v74_v46  ;;  %1278 = vmatmul.mubr.msk.f32.vlgmr.msra.gmra.mrb[0].mxu1 %vm105_vm0, %v82_v47 }
  0x45   :  { %1268 = vmatprep.mubr.msk.f32.mxu0 %vm105_vm0, %v75_v48  ;;  %1280 = vmatprep.mubr.msk.f32.mxu1 %vm105_vm0, %v83_v49 }
  0x48   :  { %1269 = vmatmul.mubr.msk.f32.gmra.mrb[2].mxu0 %vm105_vm0, %v76_v50  ;;  %1281 = vmatmul.mubr.msk.f32.gmra.mrb[2].mxu1 %vm105_vm0, %v84_v51 }
  0x49   :  { %1271 = vmatprep.mubr.msk.f32.mxu0 %vm105_vm0, %v77_v52  ;;  %1283 = vmatprep.mubr.msk.f32.mxu1 %vm105_vm0, %v85_v53 }
  0x4c   :  { %1272 = vmatmul.mubr.msk.f32.gmra.mrb[4].mxu0 %vm105_vm0, %v78_v54  ;;  %1284 = vmatmul.mubr.msk.f32.gmra.mrb[4].mxu1 %vm105_vm0, %v86_v55 }
  0x4d   :  { %1274 = vmatprep.mubr.msk.f32.mxu0 %vm105_vm0, %v79_v56  ;;  %1286 = vmatprep.mubr.msk.f32.mxu1 %vm105_vm0, %v87_v57 }
  0x50   :  { %1275 = vmatmul.mubr.msk.f32.gmra.mrb[6].mxu0 %vm105_vm0, %v80_v58  ;;  %1287 = vmatmul.mubr.msk.f32.gmra.mrb[6].mxu1 %vm105_vm0, %v88_v59 }
  0x86   :  { %v366_v61 = vpop.permute.xlu0 %365 }
  0x87   :  { %v376_v62 = vpop.permute.xlu1 %375 }
  0x8a   :  { %v371_v63 = vpop.permute.xlu0 %370 }
  0x8b   :  { %v381_v0 = vpop.permute.xlu1 %380 }
  0x8e   :  { %v386_v1 = vpop.permute.xlu0 %385 }
  0x8f   :  { %v391_v2 = vpop.permute.xlu1 %390 }
  0x92   :  { %v396_v3 = vpop.permute.xlu0 %395 }
  0x93   :  { %v1739_v4 = vpop.permute.xlu1 %400 }
  0x96   :  { %v406_v6 = vpop.permute.xlu0 %405 }
  0x97   :  { %v411_v7 = vpop.permute.xlu1 %410 }
  0x9a   :  { %v416_v18 = vpop.permute.xlu0 %415 }
  0x9b   :  { %v421_v31 = vpop.permute.xlu1 %420 }
  0x9e   :  { %v426_v42 = vpop.permute.xlu0 %425 }
  0x9f   :  { %v431_v59 = vpop.permute.xlu1 %430 }
  0xa2   :  { %v436_v60 = vpop.permute.xlu0 %435 }
 0x117   :  { %v1267_v9 = vpop.f32.mrb[0].mxu0  ;;  %v1279_v11 = vpop.f32.mrb[0].mxu1 }
 0x118   :  { %v444_v12 = vmul.f32 %v1267_v9, %v371_v63  ;;  %v452_v13 = vmul.f32 %v1279_v11, %v411_v7  ;;  %v268_v14 = vpop.f32.mrb[1].mxu0  ;;  %v308_v15 = vpop.f32.mrb[1].mxu1 }
 0x119   :  { %v443_v16 = vmul.f32 %v366_v61, %v268_v14  ;;  %v451_v17 = vmul.f32 %v406_v6, %v308_v15  ;;  %v441_v11 = vpop.permute.xlu1 %440  ;;  %v1456_v15 = vmov 0.0  }
 0x11a   :  { %v467_v19 = vmul.f32 %v1746_v10, %v444_v12  ;;  %v475_v20 = vmul.f32 %v1746_v10, %v452_v13  ;;  %58 = vst.msk [vmem:[#allocation4 + $0x8] sm:$0xff] %vm24_vm2, %v1456_v15  ;;  %41 = vst.msk [vmem:[#allocation3] sm:$0xff] %vm24_vm2, %v1456_v15 }
 0x11b   :  { %v466_v21 = vmul.f32 %v1746_v10, %v443_v16  ;;  %v1282_v22 = vpop.f32.mrb[2].mxu1  ;;  %v1270_v23 = vpop.f32.mrb[2].mxu0  ;;  %v474_v24 = vmul.f32 %v1746_v10, %v451_v17  ;;  %42 = vst.msk [vmem:[#allocation3 + $0x8] sm:$0xff] %vm24_vm2, %v1456_v15  ;;  %43 = vst.msk [vmem:[#allocation3 + $0x10] sm:$0xff] %vm24_vm2, %v1456_v15 }
 0x11c   :  { %v318_v25 = vpop.f32.mrb[3].mxu1  ;;  %v446_v26 = vmul.f32 %v1270_v23, %v381_v0  ;;  %v1755_v27 = vsel %vm487_vm3, %v467_v19, -inf  ;;  %v1759_v28 = vsel %vm487_vm3, %v475_v20, -inf  ;;  %v278_v29 = vpop.f32.mrb[3].mxu0  ;;  %v454_v35 = vmul.f32 %v1282_v22, %v421_v31  ;;  %44 = vst.msk [vmem:[#allocation3 + $0x18] sm:$0xff] %vm24_vm2, %v1456_v15  ;;  %45 = vst.msk [vmem:[#allocation3 + $0x20] sm:$0xff] %vm24_vm2, %v1456_v15 }
 0x11d   :  { %v453_v30 = vmul.f32 %v416_v18, %v318_v25  ;;  %522 = vmax.xlane.f32.xlu1 %v1755_v27  ;;  %538 = vmax.xlane.f32.xlu0 %v1759_v28  ;;  %v1767_v39 = vsel %vm487_vm3, %v474_v24, -inf  ;;  %v1771_v40 = vsel %vm487_vm3, %v466_v21, -inf  ;;  %v445_v44 = vmul.f32 %v376_v62, %v278_v29  ;;  %46 = vst.msk [vmem:[#allocation3 + $0x28] sm:$0xff] %vm24_vm2, %v1456_v15  ;;  %v875_v19 = vld [vmem:[%s2323_s0 + $0x10] sm:$0xff]  ;;  %v1884_v20 = vpop.permute.xlu0 %890  ;;  %v1886_v21 = vpop.permute.xlu1 %893  ;;  %v1888_v22 = vld [vmem:[#allocation2 + $0x8] sm:$0xff]  ;;  %v1900_v31 = vld [vmem:[#allocation2] sm:$0xff] }
 0x11e   :  { %v469_v32 = vmul.f32 %v1746_v10, %v446_v26  ;;  %v477_v47 = vmul.f32 %v1746_v10, %v454_v35  ;;  %47 = vst.msk [vmem:[#allocation3 + $0x30] sm:$0xff] %vm24_vm2, %v1456_v15  ;;  %48 = vst.msk [vmem:[#allocation3 + $0x38] sm:$0xff] %vm24_vm2, %v1456_v15  ;;  %v1890_v23 = vld [vmem:[#allocation2 + $0x48] sm:$0xff]  ;;  %vm938_vm4 = vcmp.eq.s32.totalorder %v1741_v8, %v1886_v21 }
 0x11f   :  { %v1273_v33 = vpop.f32.mrb[4].mxu0  ;;  %v1285_v34 = vpop.f32.mrb[4].mxu1  ;;  %v476_v36 = vmul.f32 %v1746_v10, %v453_v30  ;;  %v468_v53 = vmul.f32 %v1746_v10, %v445_v44  ;;  %49 = vst.msk [vmem:[#allocation3 + $0x40] sm:$0xff] %vm24_vm2, %v1456_v15  ;;  %50 = vst.msk [vmem:[#allocation3 + $0x48] sm:$0xff] %vm24_vm2, %v1456_v15  ;;  %v1898_v30 = vld [vmem:[#allocation2 + $0x40] sm:$0xff]  ;;  %vm937_vm6 = vcmp.eq.s32.totalorder %v1741_v8, %v1884_v20 }
 0x120   :  { %v288_v37 = vpop.f32.mrb[5].mxu0  ;;  %v328_v38 = vpop.f32.mrb[5].mxu1  ;;  %v1777_v43 = vsel %vm487_vm3, %v469_v32, -inf  ;;  %v448_v54 = vmul.f32 %v1273_v33, %v391_v2  ;;  %v1795_v58 = vsel %vm487_vm3, %v477_v47, -inf  ;;  %v456_v61 = vmul.f32 %v1285_v34, %v431_v59  ;;  %51 = vst.msk [vmem:[#allocation3 + $0x50] sm:$0xff] %vm24_vm2, %v1456_v15  ;;  %52 = vst.msk [vmem:[#allocation3 + $0x58] sm:$0xff] %vm24_vm2, %v1456_v15 }
 0x121   :  { %v447_v41 = vmul.f32 %v386_v1, %v288_v37  ;;  %536 = vmax.xlane.f32.xlu1 %v1767_v39  ;;  %520 = vmax.xlane.f32.xlu0 %v1771_v40  ;;  %v455_v49 = vmul.f32 %v426_v42, %v328_v38  ;;  %v1783_v52 = vsel %vm487_vm3, %v476_v36, -inf  ;;  %v1801_v62 = vsel %vm487_vm3, %v468_v53, -inf  ;;  %53 = vst.msk [vmem:[#allocation3 + $0x60] sm:$0xff] %vm24_vm2, %v1456_v15  ;;  %v1918_v38 = vld [vmem:[#allocation2 + $0x50] sm:$0xff] }
 0x122   :  { %v471_v63 = vmul.f32 %v1746_v10, %v448_v54  ;;  %v479_v5 = vmul.f32 %v1746_v10, %v456_v61  ;;  %54 = vst.msk [vmem:[#allocation3 + $0x68] sm:$0xff] %vm24_vm2, %v1456_v15  ;;  %55 = vst.msk [vmem:[#allocation3 + $0x70] sm:$0xff] %vm24_vm2, %v1456_v15  ;;  %v1960_v61 = vld [vmem:[#allocation2 + $0x10] sm:$0xff] }
 0x123   :  { %v1276_v45 = vpop.f32.mrb[6].mxu0  ;;  %v1288_v46 = vpop.f32.mrb[6].mxu1  ;;  %v470_v48 = vmul.f32 %v1746_v10, %v447_v41  ;;  %v478_v55 = vmul.f32 %v1746_v10, %v455_v49  ;;  %56 = vst.msk [vmem:[#allocation3 + $0x78] sm:$0xff] %vm24_vm2, %v1456_v15  ;;  %57 = vst.msk [vmem:[#allocation4] sm:$0xff] %vm24_vm2, %v1456_v15  ;;  %v1920_v41 = vld [vmem:[#allocation2 + $0x18] sm:$0xff]  ;;  %v1938_v49 = vld [vmem:[#allocation2 + $0x20] sm:$0xff] }
 0x124   :  { %v298_v50 = vpop.f32.mrb[7].mxu0  ;;  %v338_v51 = vpop.f32.mrb[7].mxu1  ;;  %v1820_v9 = vsel %vm487_vm3, %v471_v63, -inf  ;;  %v1831_v14 = vsel %vm487_vm3, %v479_v5, -inf  ;;  %59 = vst.msk [vmem:[#allocation4 + $0x10] sm:$0xff] %vm24_vm2, %v1456_v15  ;;  %60 = vst.msk [vmem:[#allocation4 + $0x18] sm:$0xff] %vm24_vm2, %v1456_v15 }
 0x125   :  { %540 = vmax.xlane.f32.xlu1 %v1783_v52  ;;  %526 = vmax.xlane.f32.xlu0 %v1777_v43  ;;  %v449_v56 = vmul.f32 %v396_v3, %v298_v50  ;;  %v1791_v57 = vsel %vm487_vm3, %v470_v48, -inf  ;;  %v457_v1 = vmul.f32 %v436_v60, %v338_v51  ;;  %v1807_v2 = vsel %vm487_vm3, %v478_v55, -inf  ;;  %61 = vst.msk [vmem:[#allocation4 + $0x20] sm:$0xff] %vm24_vm2, %v1456_v15  ;;  %v1940_v50 = vld [vmem:[#allocation2 + $0x58] sm:$0xff]  ;;  %v1958_v60 = vld [vmem:[#allocation2 + $0x60] sm:$0xff] }
 0x126   :  { %v450_v3 = vmul.f32 %v1276_v45, %v1739_v4  ;;  %v458_v4 = vmul.f32 %v1288_v46, %v441_v11  ;;  %62 = vst.msk [vmem:[#allocation4 + $0x28] sm:$0xff] %vm24_vm2, %v1456_v15  ;;  %63 = vst.msk [vmem:[#allocation4 + $0x30] sm:$0xff] %vm24_vm2, %v1456_v15  ;;  %v1978_v11 = vld [vmem:[#allocation2 + $0x30] sm:$0xff] }
 0x127   :  { %v472_v0 = vmul.f32 %v1746_v10, %v449_v56  ;;  %v480_v6 = vmul.f32 %v1746_v10, %v457_v1  ;;  %64 = vst.msk [vmem:[#allocation4 + $0x38] sm:$0xff] %vm24_vm2, %v1456_v15  ;;  %65 = vst.msk [vmem:[#allocation4 + $0x40] sm:$0xff] %vm24_vm2, %v1456_v15 }
 0x128   :  { %v473_v12 = vmul.f32 %v1746_v10, %v450_v3  ;;  %66 = vst.msk [vmem:[#allocation4 + $0x48] sm:$0xff] %vm24_vm2, %v1456_v15  ;;  %67 = vst.msk [vmem:[#allocation4 + $0x50] sm:$0xff] %vm24_vm2, %v1456_v15  ;;  %v481_v16 = vmul.f32 %v1746_v10, %v458_v4  ;;  %v876_v10 = vld [vmem:[%s2323_s0 + $0x18] sm:$0xff] }
 0x129   :  { %528 = vmax.xlane.f32.xlu1 %v1791_v57  ;;  %542 = vmax.xlane.f32.xlu0 %v1795_v58  ;;  %v1816_v7 = vsel %vm487_vm3, %v472_v0, -inf  ;;  %v1827_v13 = vsel %vm487_vm3, %v480_v6, -inf  ;;  %68 = vst.msk [vmem:[#allocation4 + $0x58] sm:$0xff] %vm24_vm2, %v1456_v15  ;;  %69 = vst.msk [vmem:[#allocation4 + $0x60] sm:$0xff] %vm24_vm2, %v1456_v15  ;;  %v883_v0 = vld [vmem:[%s2323_s0 + $0x50] sm:$0xff] }
 0x12a   :  { %70 = vst.msk [vmem:[#allocation4 + $0x68] sm:$0xff] %vm24_vm2, %v1456_v15  ;;  %71 = vst.msk [vmem:[#allocation4 + $0x70] sm:$0xff] %vm24_vm2, %v1456_v15  ;;  %v1870_v17 = vsel %vm487_vm3, %v473_v12, -inf  ;;  %v1875_v18 = vsel %vm487_vm3, %v481_v16, -inf  ;;  %v1980_v12 = vld [vmem:[#allocation2 + $0x28] sm:$0xff] }
 0x12b   :  { %72 = vst.msk [vmem:[#allocation4 + $0x78] sm:$0xff] %vm24_vm2, %v1456_v15  ;;  %2335 = vst [vmem:[#allocation5_spill] sm:$0xff] %v1978_v11 }
 0x12d   :  { %544 = vmax.xlane.f32.xlu1 %v1807_v2  ;;  %524 = vmax.xlane.f32.xlu0 %v1801_v62 }
 0x131   :  { %532 = vmax.xlane.f32.xlu1 %v1816_v7  ;;  %530 = vmax.xlane.f32.xlu0 %v1820_v9 }
 0x135   :  { %548 = vmax.xlane.f32.xlu1 %v1827_v13  ;;  %546 = vmax.xlane.f32.xlu0 %v1831_v14 }
 0x139   :  { %534 = vmax.xlane.f32.xlu0 %v1870_v17 }
 0x13d   :  { %550 = vmax.xlane.f32.xlu0 %v1875_v18 }
 0x146   :  { %896 = vperm.xlu1 %1357, %v875_v19  }
 0x153   :  { %899 = vperm.xlu0 %1356, %v876_v10   ;;  %v878_v10 = vld [vmem:[%s2323_s0 + $0x28] sm:$0xff] }
 0x1aa   :  { %v523_v24 = vpop.xlane.xlu1 %522  ;;  %v539_v25 = vpop.xlane.xlu0 %538 }
 0x1ab   :  { %v1893_v26 = vmax.f32 %v1888_v22, %v523_v24  ;;  %v1896_v29 = vmax.f32 %v1890_v23, %v539_v25 }
 0x1ad   :  { %842 = vst.msk [vmem:[#allocation2 + $0x8] sm:$0xff] %vm24_vm2, %v1893_v26  ;;  %850 = vst.msk [vmem:[#allocation2 + $0x48] sm:$0xff] %vm24_vm2, %v1896_v29  ;;  %655 = vperm.xlu0 %1356, %v1893_v26   ;;  %695 = vperm.xlu1 %1357, %v1896_v29  }
 0x1ae   :  { %v537_v34 = vpop.xlane.xlu1 %536  ;;  %v521_v35 = vpop.xlane.xlu0 %520 }
 0x1af   :  { %v1913_v36 = vmax.f32 %v1898_v30, %v537_v34  ;;  %v1916_v37 = vmax.f32 %v1900_v31, %v521_v35  ;;  %v2001_v34 = vld [vmem:[#allocation2 + $0x70] sm:$0xff]  ;;  %v2003_v35 = vld [vmem:[#allocation2 + $0x68] sm:$0xff] }
 0x1b0   :  { %2336 = vst [vmem:[#allocation6_spill] sm:$0xff] %v2001_v34 }
 0x1b1   :  { %849 = vst.msk [vmem:[#allocation2 + $0x40] sm:$0xff] %vm24_vm2, %v1913_v36  ;;  %841 = vst.msk [vmem:[#allocation2] sm:$0xff] %vm24_vm2, %v1916_v37  ;;  %690 = vperm.xlu0 %1356, %v1913_v36   ;;  %650 = vperm.xlu1 %1357, %v1916_v37  }
 0x1b2   :  { %v541_v45 = vpop.xlane.xlu1 %540  ;;  %v527_v46 = vpop.xlane.xlu0 %526 }
 0x1b3   :  { %v1933_v47 = vmax.f32 %v1918_v38, %v541_v45  ;;  %v1936_v48 = vmax.f32 %v1920_v41, %v527_v46 }
 0x1b5   :  { %851 = vst.msk [vmem:[#allocation2 + $0x50] sm:$0xff] %vm24_vm2, %v1933_v47  ;;  %844 = vst.msk [vmem:[#allocation2 + $0x18] sm:$0xff] %vm24_vm2, %v1936_v48  ;;  %700 = vperm.xlu0 %1356, %v1933_v47   ;;  %665 = vperm.xlu1 %1357, %v1936_v48  }
 0x1b6   :  { %v529_v54 = vpop.xlane.xlu1 %528  ;;  %v543_v55 = vpop.xlane.xlu0 %542 }
 0x1b7   :  { %v1953_v56 = vmax.f32 %v1938_v49, %v529_v54  ;;  %v1956_v59 = vmax.f32 %v1940_v50, %v543_v55 }
 0x1b9   :  { %845 = vst.msk [vmem:[#allocation2 + $0x20] sm:$0xff] %vm24_vm2, %v1953_v56  ;;  %852 = vst.msk [vmem:[#allocation2 + $0x58] sm:$0xff] %vm24_vm2, %v1956_v59  ;;  %670 = vperm.xlu0 %1356, %v1953_v56   ;;  %705 = vperm.xlu1 %1357, %v1956_v59  }
 0x1ba   :  { %v545_v1 = vpop.xlane.xlu1 %544  ;;  %v525_v3 = vpop.xlane.xlu0 %524 }
 0x1bb   :  { %v1973_v5 = vmax.f32 %v1958_v60, %v545_v1  ;;  %v1976_v6 = vmax.f32 %v1960_v61, %v525_v3  ;;  %v2018_v3 = vld [vmem:[#allocation2 + $0x38] sm:$0xff] }
 0x1bc   :  { %2338 = vst [vmem:[#allocation8_spill] sm:$0xff] %v2018_v3 }
 0x1bd   :  { %853 = vst.msk [vmem:[#allocation2 + $0x60] sm:$0xff] %vm24_vm2, %v1973_v5  ;;  %843 = vst.msk [vmem:[#allocation2 + $0x10] sm:$0xff] %vm24_vm2, %v1976_v6  ;;  %710 = vperm.xlu0 %1356, %v1973_v5   ;;  %660 = vperm.xlu1 %1357, %v1976_v6  }
 0x1be   :  { %v533_v16 = vpop.xlane.xlu1 %532  ;;  %v531_v19 = vpop.xlane.xlu0 %530 }
 0x1bf   :  { %v1996_v24 = vmax.f32 %v1978_v11, %v533_v16  ;;  %v1999_v25 = vmax.f32 %v1980_v12, %v531_v19 }
 0x1c1   :  { %847 = vst.msk [vmem:[#allocation2 + $0x30] sm:$0xff] %vm24_vm2, %v1996_v24  ;;  %846 = vst.msk [vmem:[#allocation2 + $0x28] sm:$0xff] %vm24_vm2, %v1999_v25  ;;  %905 = vperm.xlu0 %1356, %v878_v10   ;;  %675 = vperm.xlu1 %1357, %v1999_v25  }
 0x1c2   :  { %v549_v46 = vpop.xlane.xlu1 %548  ;;  %v547_v54 = vpop.xlane.xlu0 %546 }
 0x1c3   :  { %v2013_v55 = vmax.f32 %v2001_v34, %v549_v46  ;;  %v2016_v1 = vmax.f32 %v2003_v35, %v547_v54  ;;  %v2030_v46 = vld [vmem:[#allocation2 + $0x78] sm:$0xff]  ;;  %v879_v54 = vld [vmem:[%s2323_s0 + $0x30] sm:$0xff] }
 0x1c4   :  { %2340 = vst [vmem:[#allocation10_spill] sm:$0xff] %v2030_v46 }
 0x1c5   :  { %2337 = vst [vmem:[#allocation7_spill] sm:$0xff] %v2016_v1  ;;  %855 = vst.msk [vmem:[#allocation2 + $0x70] sm:$0xff] %vm24_vm2, %v2013_v55  ;;  %715 = vperm.xlu1 %1357, %v2016_v1  }
 0x1c6   :  { %854 = vst.msk [vmem:[#allocation2 + $0x68] sm:$0xff] %vm24_vm2, %v2016_v1  ;;  %v535_v19 = vpop.xlane.xlu0 %534  ;;  %v897_v21 = vpop.permute.xlu1 %896 }
 0x1c7   :  { %v2028_v10 = vmax.f32 %v2018_v3, %v535_v19  ;;  %v877_v19 = vld [vmem:[%s2323_s0 + $0x20] sm:$0xff]  ;;  %vm939_vm7 = vcmp.eq.s32.totalorder %v1741_v8, %v897_v21 }
 0x1c9   :  { %2339 = vst [vmem:[#allocation9_spill] sm:$0xff] %v2028_v10  ;;  %848 = vst.msk [vmem:[#allocation2 + $0x38] sm:$0xff] %vm24_vm2, %v2028_v10  ;;  %685 = vperm.xlu1 %1357, %v2028_v10  }
 0x1ca   :  { %v551_v16 = vpop.xlane.xlu0 %550 }
 0x1cb   :  { %v2038_v15 = vmax.f32 %v2030_v46, %v551_v16  ;;  %v881_v16 = vld [vmem:[%s2323_s0 + $0x40] sm:$0xff] }
 0x1cd   :  { %2341 = vst [vmem:[#allocation11_spill] sm:$0xff] %v2038_v15  ;;  %856 = vst.msk [vmem:[#allocation2 + $0x78] sm:$0xff] %vm24_vm2, %v2038_v15  ;;  %725 = vperm.xlu1 %1357, %v2038_v15  }
 0x1d1   :  { %902 = vperm.xlu1 %1357, %v877_v19   ;;  %v885_v19 = vld [vmem:[%s2323_s0 + $0x60] sm:$0xff] }
 0x1d2   :  { %v900_v53 = vpop.permute.xlu0 %899 }
 0x1d3   :  { %vm940_vm5 = vcmp.eq.s32.totalorder %v1741_v8, %v900_v53  ;;  %v955_v53 = vsel %vm939_vm7, %v1801_v62, 0.0 }
 0x1d4   :  { %v956_v44 = vsel %vm940_vm5, %v1777_v43, 0.0 }
 0x1d5   :  { %908 = vperm.xlu1 %1357, %v879_v54   ;;  %v954_v54 = vsel %vm938_vm4, %v1755_v27, 0.0 }
 0x1d9   :  { %914 = vperm.xlu1 %1357, %v881_v16   ;;  %v887_v16 = vld [vmem:[%s2323_s0 + $0x70] sm:$0xff] }
 0x1dd   :  { %920 = vperm.xlu1 %1357, %v883_v0   ;;  %v953_v0 = vsel %vm937_vm6, %v1771_v40, 0.0 }
 0x1e0   :  { %971 = vadd.xlane.f32.xlu0 %v954_v54 }
 0x1e1   :  { %926 = vperm.xlu1 %1357, %v885_v19  }
 0x1e4   :  { %975 = vadd.xlane.f32.xlu0 %v956_v44 }
 0x1e5   :  { %932 = vperm.xlu1 %1357, %v887_v16  }
 0x209   :  { %969 = vadd.xlane.f32.xlu1 %v953_v0 }
 0x20d   :  { %973 = vadd.xlane.f32.xlu1 %v955_v53 }
 0x22c   :  { %v2073_v19 = vpop.permute.xlu1 %695  ;;  %v656_v54 = vpop.permute.xlu0 %655 }
 0x22d   :  { %v729_v32 = vsub.f32 %v1755_v27, %v656_v54 }
 0x22f   :  { %v746_v46 = vmul.f32 1.442695, %v729_v32 }
 0x230   :  { %v2075_v33 = vpop.permute.xlu1 %650  ;;  %v691_v4 = vpop.permute.xlu0 %690 }
 0x231   :  { %v736_v34 = vsub.f32 %v1767_v39, %v691_v4  ;;  %1358 = vpow2.f32 %v746_v46  ;;  %v880_v4 = vld [vmem:[%s2323_s0 + $0x38] sm:$0xff] }
 0x233   :  { %v760_v10 = vmul.f32 1.442695, %v736_v34 }
 0x234   :  { %v2077_v44 = vpop.permute.xlu1 %665  ;;  %v701_v16 = vpop.permute.xlu0 %700 }
 0x235   :  { %v738_v3 = vsub.f32 %v1783_v52, %v701_v16  ;;  %1360 = vpow2.f32 %v760_v10 }
 0x238   :  { %v2079_v63 = vpop.permute.xlu1 %705  ;;  %v671_v20 = vpop.permute.xlu0 %670 }
 0x239   :  { %v732_v34 = vsub.f32 %v1791_v57, %v671_v20 }
 0x23b   :  { %v1359_v46 = vpop.eup %1358 }
 0x23c   :  { %v2081_v45 = vpop.permute.xlu1 %660  ;;  %v711_v51 = vpop.permute.xlu0 %710 }
 0x23d   :  { %v740_v10 = vsub.f32 %v1807_v2, %v711_v51 }
 0x23f   :  { %v1361_v16 = vpop.eup %1360 }
 0x240   :  { %v676_v21 = vpop.permute.xlu1 %675  ;;  %v906_v0 = vpop.permute.xlu0 %905 }
 0x241   :  { %vm942_vm8 = vcmp.eq.s32.totalorder %v1741_v8, %v906_v0  ;;  %v733_v27 = vsub.f32 %v1820_v9, %v676_v21  ;;  %v884_v21 = vld [vmem:[%s2323_s0 + $0x58] sm:$0xff] }
 0x242   :  { %v958_v53 = vsel %vm942_vm8, %v1820_v9, 0.0  ;;  %v882_v9 = vld [vmem:[%s2323_s0 + $0x48] sm:$0xff] }
 0x243   :  { %979 = vadd.xlane.f32.xlu0 %v958_v53  ;;  %v764_v53 = vmul.f32 1.442695, %v738_v3  ;;  %v752_v3 = vmul.f32 1.442695, %v732_v34 }
 0x244   :  { %v2085_v42 = vpop.permute.xlu1 %715 }
 0x245   :  { %1362 = vpow2.f32 %v764_v53  ;;  %v888_v53 = vld [vmem:[%s2323_s0 + $0x78] sm:$0xff] }
 0x248   :  { %v2088_v15 = vpop.permute.xlu1 %685 }
 0x24c   :  { %v2091_v11 = vpop.permute.xlu1 %725 }
 0x24f   :  { %v1363_v20 = vpop.eup %1362 }
 0x250   :  { %v903_v1 = vpop.permute.xlu1 %902 }
 0x251   :  { %vm941_vm9 = vcmp.eq.s32.totalorder %v1741_v8, %v903_v1  ;;  %v754_v1 = vmul.f32 1.442695, %v733_v27 }
 0x252   :  { %v957_v0 = vsel %vm941_vm9, %v1791_v57, 0.0  ;;  %v768_v57 = vmul.f32 1.442695, %v740_v10 }
 0x253   :  { %977 = vadd.xlane.f32.xlu1 %v957_v0  ;;  %1364 = vpow2.f32 %v754_v1  ;;  %v886_v0 = vld [vmem:[%s2323_s0 + $0x68] sm:$0xff]  ;;  %v860_v1 = vld [vmem:[#allocation4 + $0x18] sm:$0xff] }
 0x254   :  { %v909_v54 = vpop.permute.xlu1 %908  ;;  %1366 = vpow2.f32 %v752_v3 }
 0x255   :  { %vm943_vm10 = vcmp.eq.s32.totalorder %v1741_v8, %v909_v54  ;;  %1368 = vpow2.f32 %v768_v57  ;;  %v858_v54 = vld [vmem:[#allocation4 + $0x8] sm:$0xff]  ;;  %v857_v57 = vld [vmem:[#allocation4] sm:$0xff] }
 0x256   :  { %v959_v32 = vsel %vm943_vm10, %v1816_v7, 0.0 }
 0x257   :  { %981 = vadd.xlane.f32.xlu1 %v959_v32 }
 0x258   :  { %v2120_v3 = vpop.permute.xlu1 %914 }
 0x259   :  { %911 = vperm.xlu0 %1356, %v880_v4   ;;  %vm945_vm13 = vcmp.eq.s32.totalorder %v1741_v8, %v2120_v3 }
 0x25b   :  { %778 = vadd.xlane.f32.xlu1 %v1359_v46 }
 0x25c   :  { %v2122_v10 = vpop.permute.xlu1 %920 }
 0x25d   :  { %917 = vperm.xlu0 %1356, %v882_v9   ;;  %v1365_v51 = vpop.eup %1364  ;;  %vm947_vm15 = vcmp.eq.s32.totalorder %v1741_v8, %v2122_v10 }
 0x25e   :  { %v1367_v27 = vpop.eup %1366 }
 0x25f   :  { %792 = vadd.xlane.f32.xlu1 %v1361_v16  ;;  %v1369_v4 = vpop.eup %1368 }
 0x260   :  { %v2124_v16 = vpop.permute.xlu1 %926 }
 0x261   :  { %923 = vperm.xlu0 %1356, %v884_v21   ;;  %vm949_vm1 = vcmp.eq.s32.totalorder %v1741_v8, %v2124_v16 }
 0x263   :  { %796 = vadd.xlane.f32.xlu1 %v1363_v20 }
 0x264   :  { %v2126_v21 = vpop.permute.xlu1 %932 }
 0x265   :  { %929 = vperm.xlu0 %1356, %v886_v0   ;;  %vm951_vm4 = vcmp.eq.s32.totalorder %v1741_v8, %v2126_v21 }
 0x267   :  { %786 = vadd.xlane.f32.xlu1 %v1365_v51  ;;  %v859_v51 = vld [vmem:[#allocation4 + $0x10] sm:$0xff] }
 0x269   :  { %935 = vperm.xlu0 %1356, %v888_v53  }
 0x26b   :  { %784 = vadd.xlane.f32.xlu1 %v1367_v27 }
 0x26d   :  { %680 = vperm.xlu0 %1356, %v1996_v24   ;;  %v972_v32 = vpop.xlane.xlu0 %971 }
 0x26e   :  { %v1002_v34 = vadd.f32 %v972_v32, %v858_v54  ;;  %v737_v54 = vsub.f32 %v1759_v28, %v2073_v19  ;;  %v862_v32 = vld [vmem:[#allocation4 + $0x28] sm:$0xff] }
 0x26f   :  { %800 = vadd.xlane.f32.xlu1 %v1369_v4 }
 0x270   :  { %1018 = vst.msk [vmem:[#allocation4 + $0x8] sm:$0xff] %vm24_vm2, %v1002_v34  ;;  %v762_v4 = vmul.f32 1.442695, %v737_v54  ;;  %v728_v34 = vsub.f32 %v1771_v40, %v2075_v33  ;;  %v2343_v40 = vsub.f32 %v1898_v30, %v1913_v36  ;;  %v741_v36 = vsub.f32 %v1831_v14, %v2085_v42 }
 0x271   :  { %720 = vperm.xlu0 %1356, %v2013_v55   ;;  %v976_v46 = vpop.xlane.xlu0 %975  ;;  %v735_v42 = vsub.f32 %v1870_v17, %v2088_v15 }
 0x272   :  { %v1004_v9 = vadd.f32 %v976_v46, %v860_v1  ;;  %1370 = vpow2.f32 %v762_v4  ;;  %v600_v33 = vmul.f32 1.442695, %v2343_v40 }
 0x274   :  { %1020 = vst.msk [vmem:[#allocation4 + $0x18] sm:$0xff] %vm24_vm2, %v1004_v9  ;;  %v744_v9 = vmul.f32 1.442695, %v728_v34 }
 0x276   :  { %1372 = vpow2.f32 %v744_v9  ;;  %v863_v9 = vld [vmem:[#allocation4 + $0x30] sm:$0xff] }
 0x296   :  { %v970_v20 = vpop.xlane.xlu1 %969 }
 0x297   :  { %v1001_v0 = vadd.f32 %v970_v20, %v857_v57  ;;  %v731_v57 = vsub.f32 %v1777_v43, %v2077_v44  ;;  %v2342_v20 = vsub.f32 %v1888_v22, %v1893_v26  ;;  %v730_v22 = vsub.f32 %v1801_v62, %v2081_v45  ;;  %v1371_v44 = vpop.eup %1370 }
 0x298   :  { %v1373_v62 = vpop.eup %1372  ;;  %v2345_v45 = vsub.f32 %v1980_v12, %v1999_v25  ;;  %v2346_v12 = vsub.f32 %v1938_v49, %v1953_v56  ;;  %v2347_v49 = vsub.f32 %v1958_v60, %v1973_v5 }
 0x299   :  { %1017 = vst.msk [vmem:[#allocation4] sm:$0xff] %vm24_vm2, %v1001_v0  ;;  %v586_v0 = vmul.f32 1.442695, %v2342_v20  ;;  %v750_v19 = vmul.f32 1.442695, %v731_v57 }
 0x29a   :  { %v974_v53 = vpop.xlane.xlu1 %973  ;;  %v748_v30 = vmul.f32 1.442695, %v730_v22  ;;  %v592_v25 = vmul.f32 1.442695, %v2346_v12  ;;  %v608_v56 = vmul.f32 1.442695, %v2347_v49 }
 0x29b   :  { %v1003_v27 = vadd.f32 %v974_v53, %v859_v51  ;;  %v739_v51 = vsub.f32 %v1795_v58, %v2079_v63  ;;  %1374 = vpow2.f32 %v586_v0  ;;  %v2344_v63 = vsub.f32 %v1918_v38, %v1933_v47  ;;  %v617_v0 = vld [vmem:[#allocation3 + $0x8] sm:$0xff] }
 0x29c   :  { %1376 = vpow2.f32 %v750_v19  ;;  %v770_v47 = vmul.f32 1.442695, %v741_v36  ;;  %v626_v36 = vld [vmem:[#allocation3 + $0x50] sm:$0xff] }
 0x29d   :  { %1019 = vst.msk [vmem:[#allocation4 + $0x10] sm:$0xff] %vm24_vm2, %v1003_v27  ;;  %v766_v43 = vmul.f32 1.442695, %v739_v51  ;;  %1378 = vpow2.f32 %v600_v33  ;;  %v604_v54 = vmul.f32 1.442695, %v2344_v63 }
 0x29e   :  { %v758_v33 = vmul.f32 1.442695, %v735_v42 }
 0x29f   :  { %1380 = vpow2.f32 %v766_v43  ;;  %v624_v43 = vld [vmem:[#allocation3 + $0x40] sm:$0xff] }
 0x2a0   :  { %1382 = vpow2.f32 %v604_v54 }
 0x2a1   :  { %1384 = vpow2.f32 %v748_v30 }
 0x2a5   :  { %v1375_v38 = vpop.eup %1374 }
 0x2a6   :  { %v1377_v51 = vpop.eup %1376 }
 0x2a7   :  { %v1379_v40 = vpop.eup %1378 }
 0x2a8   :  { %v640_v63 = vmul.f32 %v1379_v40, %v624_v43  ;;  %v628_v43 = vld [vmem:[#allocation3 + $0x60] sm:$0xff] }
 0x2d0   :  { %v980_v1 = vpop.xlane.xlu0 %979 }
 0x2d1   :  { %v1006_v46 = vadd.f32 %v980_v1, %v862_v32  ;;  %v861_v32 = vld [vmem:[#allocation4 + $0x20] sm:$0xff] }
 0x2d3   :  { %1022 = vst.msk [vmem:[#allocation4 + $0x28] sm:$0xff] %vm24_vm2, %v1006_v46  ;;  %v594_v46 = vmul.f32 1.442695, %v2345_v45 }
 0x2d5   :  { %1386 = vpow2.f32 %v594_v46 }
 0x2d6   :  { %1388 = vpow2.f32 %v770_v47 }
 0x2d7   :  { %1390 = vpow2.f32 %v592_v25  ;;  %v620_v25 = vld [vmem:[#allocation3 + $0x20] sm:$0xff] }
 0x2d8   :  { %v912_v53 = vpop.permute.xlu0 %911  ;;  %1392 = vpow2.f32 %v758_v33 }
 0x2d9   :  { %vm944_vm11 = vcmp.eq.s32.totalorder %v1741_v8, %v912_v53  ;;  %v633_v53 = vmul.f32 %v1375_v38, %v617_v0  ;;  %1394 = vpow2.f32 %v608_v56  ;;  %v621_v38 = vld [vmem:[#allocation3 + $0x28] sm:$0xff] }
 0x2da   :  { %v960_v27 = vsel %vm944_vm11, %v1870_v17, 0.0  ;;  %v743_v17 = vsub.f32 %v1875_v18, %v2091_v11 }
 0x2db   :  { %983 = vadd.xlane.f32.xlu0 %v960_v27 }
 0x2dc   :  { %v2149_v26 = vpop.permute.xlu0 %917 }
 0x2dd   :  { %vm946_vm12 = vcmp.eq.s32.totalorder %v1741_v8, %v2149_v26  ;;  %v961_v26 = vsel %vm945_vm13, %v1767_v39, 0.0 }
 0x2df   :  { %794 = vadd.xlane.f32.xlu0 %v1371_v44  ;;  %v1381_v44 = vpop.eup %1380 }
 0x2e0   :  { %v978_v4 = vpop.xlane.xlu1 %977  ;;  %v2156_v34 = vpop.permute.xlu0 %923 }
 0x2e1   :  { %v1005_v1 = vadd.f32 %v978_v4, %v861_v32  ;;  %v1383_v54 = vpop.eup %1382  ;;  %v774_v32 = vmul.f32 1.442695, %v743_v17  ;;  %vm948_vm14 = vcmp.eq.s32.totalorder %v1741_v8, %v2156_v34 }
 0x2e2   :  { %v642_v60 = vmul.f32 %v1383_v54, %v626_v36  ;;  %v964_v3 = vsel %vm948_vm14, %v1795_v58, 0.0  ;;  %v965_v58 = vsel %vm949_vm1, %v1807_v2, 0.0 }
 0x2e3   :  { %1021 = vst.msk [vmem:[#allocation4 + $0x20] sm:$0xff] %vm24_vm2, %v1005_v1  ;;  %776 = vadd.xlane.f32.xlu0 %v1373_v62  ;;  %v1385_v62 = vpop.eup %1384  ;;  %1396 = vpow2.f32 %v774_v32 }
 0x2e4   :  { %v982_v57 = vpop.xlane.xlu1 %981  ;;  %v2164_v20 = vpop.permute.xlu0 %929 }
 0x2e5   :  { %v1007_v19 = vadd.f32 %v982_v57, %v863_v9  ;;  %v1387_v5 = vpop.eup %1386  ;;  %vm950_vm0 = vcmp.eq.s32.totalorder %v1741_v8, %v2164_v20 }
 0x2e6   :  { %v1389_v57 = vpop.eup %1388  ;;  %v966_v34 = vsel %vm950_vm0, %v1831_v14, 0.0  ;;  %v967_v14 = vsel %vm951_vm4, %v1827_v13, 0.0 }
 0x2e7   :  { %1023 = vst.msk [vmem:[#allocation4 + $0x30] sm:$0xff] %vm24_vm2, %v1007_v19  ;;  %782 = vadd.xlane.f32.xlu0 %v1377_v51  ;;  %v637_v19 = vmul.f32 %v1387_v5, %v621_v38  ;;  %v1391_v51 = vpop.eup %1390 }
 0x2e8   :  { %v779_v15 = vpop.xlane.xlu1 %778  ;;  %v2172_v27 = vpop.permute.xlu0 %935  ;;  %v636_v33 = vmul.f32 %v1391_v51, %v620_v25 }
 0x2e9   :  { %v809_v22 = vadd.f32 %v779_v15, %v633_v53  ;;  %v1393_v40 = vpop.eup %1392  ;;  %vm952_vm3 = vcmp.eq.s32.totalorder %v1741_v8, %v2172_v27 }
 0x2ea   :  { %v1395_v17 = vpop.eup %1394  ;;  %v1120_v8 = vld [vmem:[#allocation4 + $0x20] sm:$0xff] }
 0x2eb   :  { %826 = vst.msk [vmem:[#allocation3 + $0x8] sm:$0xff] %vm24_vm2, %v809_v22  ;;  %798 = vadd.xlane.f32.xlu0 %v1381_v44  ;;  %v644_v49 = vmul.f32 %v1395_v17, %v628_v43 }
 0x2ec   :  { %v793_v30 = vpop.xlane.xlu1 %792  ;;  %v681_v11 = vpop.permute.xlu0 %680 }
 0x2ed   :  { %v816_v4 = vadd.f32 %v793_v30, %v640_v63  ;;  %v734_v1 = vsub.f32 %v1816_v7, %v681_v11  ;;  %v1397_v44 = vpop.eup %1396 }
 0x2ef   :  { %833 = vst.msk [vmem:[#allocation3 + $0x40] sm:$0xff] %vm24_vm2, %v816_v4  ;;  %780 = vadd.xlane.f32.xlu0 %v1385_v62  ;;  %v756_v45 = vmul.f32 1.442695, %v734_v1  ;;  %v1037_v4 = vld [vmem:[#allocation2 + $0x8] sm:$0xff] }
 0x2f0   :  { %v797_v46 = vpop.xlane.xlu1 %796  ;;  %v721_v9 = vpop.permute.xlu0 %720  ;;  %v1117_v62 = vld [vmem:[#allocation4 + $0x8] sm:$0xff] }
 0x2f1   :  { %v818_v47 = vadd.f32 %v797_v46, %v642_v60  ;;  %v742_v42 = vsub.f32 %v1827_v13, %v721_v9  ;;  %v1041_v46 = vld [vmem:[#allocation2 + $0x28] sm:$0xff]  ;;  %v2349_v13 = vsub.f32 %v1900_v31, %v1916_v37  ;;  %v2352_v31 = vsub.f32 %v1960_v61, %v1976_v6  ;;  %v2355_v6 = vld [vmem:[#allocation8_spill] sm:$0xff] }
 0x2f2   :  { %v1053_v0 = vld [vmem:[#allocation3 + $0x8] sm:$0xff] }
 0x2f3   :  { %1398 = vlog2.f32 %v1053_v0  ;;  %835 = vst.msk [vmem:[#allocation3 + $0x50] sm:$0xff] %vm24_vm2, %v818_v47  ;;  %v772_v7 = vmul.f32 1.442695, %v742_v42  ;;  %802 = vadd.xlane.f32.xlu0 %v1389_v57  ;;  %v1121_v9 = vld [vmem:[#allocation4 + $0x28] sm:$0xff]  ;;  %v968_v47 = vsel %vm952_vm3, %v1875_v18, 0.0  ;;  %v1040_v42 = vld [vmem:[#allocation2 + $0x20] sm:$0xff]  ;;  %v2348_v18 = vsub.f32 %v1890_v23, %v1896_v29 }
 0x2f4   :  { %1400 = vpow2.f32 %v756_v45  ;;  %v787_v12 = vpop.xlane.xlu1 %786  ;;  %v962_v45 = vsel %vm946_vm12, %v1759_v28, 0.0  ;;  %v963_v28 = vsel %vm947_vm15, %v1783_v52, 0.0  ;;  %v584_v57 = vmul.f32 1.442695, %v2349_v13  ;;  %v625_v23 = vld [vmem:[#allocation3 + $0x48] sm:$0xff] }
 0x2f5   :  { %1402 = vpow2.f32 %v772_v7  ;;  %v813_v53 = vadd.f32 %v787_v12, %v637_v19  ;;  %v602_v27 = vmul.f32 1.442695, %v2348_v18  ;;  %v2350_v0 = vsub.f32 %v1920_v41, %v1936_v48  ;;  %v864_v12 = vld [vmem:[#allocation4 + $0x38] sm:$0xff] }
 0x2f6   :  { %v2351_v19 = vsub.f32 %v1940_v50, %v1956_v59  ;;  %v588_v37 = vmul.f32 1.442695, %v2352_v31  ;;  %v2353_v50 = vld [vmem:[#allocation7_spill] sm:$0xff] }
 0x2f7   :  { %830 = vst.msk [vmem:[#allocation3 + $0x28] sm:$0xff] %vm24_vm2, %v813_v53  ;;  %790 = vadd.xlane.f32.xlu0 %v1393_v40  ;;  %v590_v7 = vmul.f32 1.442695, %v2350_v0  ;;  %v2354_v59 = vsub.f32 %v2003_v35, %v2353_v50  ;;  %v2358_v35 = vld [vmem:[#allocation5_spill] sm:$0xff] }
 0x2f8   :  { %v785_v15 = vpop.xlane.xlu1 %784  ;;  %v606_v51 = vmul.f32 1.442695, %v2351_v19 }
 0x2f9   :  { %v812_v22 = vadd.f32 %v785_v15, %v636_v33  ;;  %v616_v33 = vld [vmem:[#allocation3] sm:$0xff]  ;;  %v610_v15 = vmul.f32 1.442695, %v2354_v59  ;;  %v630_v59 = vld [vmem:[#allocation3 + $0x70] sm:$0xff] }
 0x2fb   :  { %829 = vst.msk [vmem:[#allocation3 + $0x20] sm:$0xff] %vm24_vm2, %v812_v22  ;;  %806 = vadd.xlane.f32.xlu0 %v1397_v44 }
 0x2fc   :  { %v801_v56 = vpop.xlane.xlu1 %800 }
 0x2fd   :  { %v1399_v63 = vpop.eup %1398  ;;  %v820_v54 = vadd.f32 %v801_v56, %v644_v49  ;;  %v619_v49 = vld [vmem:[#allocation3 + $0x18] sm:$0xff]  ;;  %v2356_v56 = vld [vmem:[#allocation9_spill] sm:$0xff] }
 0x2fe   :  { %v1401_v32 = vpop.eup %1400  ;;  %v1071_v30 = vmul.f32 0.6931472, %v1399_v63  ;;  %v1057_v11 = vld [vmem:[#allocation3 + $0x28] sm:$0xff]  ;;  %v2357_v63 = vsub.f32 %v2355_v6, %v2356_v56 }
 0x2ff   :  { %v1403_v36 = vpop.eup %1402  ;;  %1404 = vlog2.f32 %v1057_v11  ;;  %837 = vst.msk [vmem:[#allocation3 + $0x60] sm:$0xff] %vm24_vm2, %v820_v54  ;;  %788 = vadd.xlane.f32.xlu0 %v1401_v32 }
 0x300   :  { %v1101_v1 = vadd.f32 %v1071_v30, %v1037_v4  ;;  %804 = vadd.xlane.f32.xlu1 %v1403_v36  ;;  %v598_v54 = vmul.f32 1.442695, %v2357_v63  ;;  %v627_v36 = vld [vmem:[#allocation3 + $0x58] sm:$0xff]  ;;  %v574_v4 = vsub.f32 %v2358_v35, %v1996_v24 }
 0x301   :  { %v1119_v63 = vld [vmem:[#allocation4 + $0x18] sm:$0xff] }
 0x302   :  { %v1133_v60 = vsub.f32 %v1101_v1, %v1117_v62  ;;  %v1056_v5 = vld [vmem:[#allocation3 + $0x20] sm:$0xff]  ;;  %v2359_v62 = vld [vmem:[#allocation6_spill] sm:$0xff] }
 0x303   :  { %1406 = vlog2.f32 %v1056_v5  ;;  %987 = vadd.xlane.f32.xlu0 %v962_v45  ;;  %v2360_v5 = vld [vmem:[#allocation10_spill] sm:$0xff]  ;;  %v2361_v45 = vld [vmem:[#allocation11_spill] sm:$0xff] }
 0x304   :  { %1149 = vst.msk [vmem:[%s2325_s5 + $0x8] sm:$0xff] %vm24_vm2, %v1133_v60  ;;  %985 = vadd.xlane.f32.xlu1 %v961_v26  ;;  %1408 = vpow2.f32 %v602_v27  ;;  %v582_v60 = vsub.f32 %v2359_v62, %v2013_v55  ;;  %v2362_v26 = vsub.f32 %v2360_v5, %v2361_v45  ;;  %v865_v62 = vld [vmem:[#allocation4 + $0x40] sm:$0xff] }
 0x305   :  { %1410 = vpow2.f32 %v584_v57  ;;  %v631_v57 = vld [vmem:[#allocation3 + $0x78] sm:$0xff] }
 0x306   :  { %1412 = vpow2.f32 %v590_v7 }
 0x307   :  { %991 = vadd.xlane.f32.xlu0 %v964_v3  ;;  %1414 = vpow2.f32 %v606_v51  ;;  %v614_v3 = vmul.f32 1.442695, %v2362_v26  ;;  %v1060_v51 = vld [vmem:[#allocation3 + $0x40] sm:$0xff] }
 0x308   :  { %989 = vadd.xlane.f32.xlu1 %v963_v28  ;;  %1416 = vpow2.f32 %v588_v37 }
 0x309   :  { %v1405_v39 = vpop.eup %1404  ;;  %1418 = vpow2.f32 %v610_v15  ;;  %v1062_v15 = vld [vmem:[#allocation3 + $0x50] sm:$0xff] }
 0x30a   :  { %v1079_v10 = vmul.f32 0.6931472, %v1405_v39  ;;  %1420 = vpow2.f32 %v598_v54 }
 0x30b   :  { %995 = vadd.xlane.f32.xlu0 %v966_v34  ;;  %v618_v34 = vld [vmem:[#allocation3 + $0x10] sm:$0xff]  ;;  %1422 = vpow2.f32 %v614_v3 }
 0x30c   :  { %v1105_v20 = vadd.f32 %v1079_v10, %v1041_v46  ;;  %993 = vadd.xlane.f32.xlu1 %v965_v58  ;;  %v596_v46 = vmul.f32 1.442695, %v574_v4 }
 0x30d   :  { %v1407_v52 = vpop.eup %1406 }
 0x30e   :  { %v1137_v16 = vsub.f32 %v1105_v20, %v1121_v9  ;;  %v1077_v38 = vmul.f32 0.6931472, %v1407_v52  ;;  %v1409_v25 = vpop.eup %1408  ;;  %v612_v20 = vmul.f32 1.442695, %v582_v60 }
 0x30f   :  { %999 = vadd.xlane.f32.xlu0 %v968_v47  ;;  %v641_v40 = vmul.f32 %v1409_v25, %v625_v23  ;;  %v1411_v41 = vpop.eup %1410  ;;  %v1036_v23 = vld [vmem:[#allocation2] sm:$0xff] }
 0x310   :  { %1153 = vst.msk [vmem:[%s2325_s5 + $0x28] sm:$0xff] %vm24_vm2, %v1137_v16  ;;  %v1104_v2 = vadd.f32 %v1077_v38, %v1040_v42  ;;  %997 = vadd.xlane.f32.xlu1 %v967_v14  ;;  %v632_v43 = vmul.f32 %v1411_v41, %v616_v33  ;;  %v1413_v22 = vpop.eup %1412  ;;  %v629_v16 = vld [vmem:[#allocation3 + $0x68] sm:$0xff]  ;;  %v622_v41 = vld [vmem:[#allocation3 + $0x30] sm:$0xff]  ;;  %v1116_v33 = vld [vmem:[#allocation4] sm:$0xff] }
 0x311   :  { %v635_v32 = vmul.f32 %v1413_v22, %v619_v49  ;;  %v1415_v30 = vpop.eup %1414 }
 0x312   :  { %v1136_v21 = vsub.f32 %v1104_v2, %v1120_v8  ;;  %v643_v28 = vmul.f32 %v1415_v30, %v627_v36  ;;  %v1417_v39 = vpop.eup %1416  ;;  %v623_v8 = vld [vmem:[#allocation3 + $0x38] sm:$0xff] }
 0x313   :  { %v634_v55 = vmul.f32 %v1417_v39, %v618_v34  ;;  %v1419_v52 = vpop.eup %1418  ;;  %v868_v34 = vld [vmem:[#allocation4 + $0x58] sm:$0xff] }
 0x314   :  { %1152 = vst.msk [vmem:[%s2325_s5 + $0x20] sm:$0xff] %vm24_vm2, %v1136_v21  ;;  %v645_v42 = vmul.f32 %v1419_v52, %v629_v16  ;;  %v1421_v14 = vpop.eup %1420  ;;  %v1118_v52 = vld [vmem:[#allocation4 + $0x10] sm:$0xff] }
 0x315   :  { %v639_v18 = vmul.f32 %v1421_v14, %v623_v8  ;;  %v1423_v27 = vpop.eup %1422 }
 0x368   :  { %v984_v53 = vpop.xlane.xlu0 %983 }
 0x369   :  { %v1008_v29 = vadd.f32 %v984_v53, %v864_v12 }
 0x36b   :  { %1024 = vst.msk [vmem:[#allocation4 + $0x38] sm:$0xff] %vm24_vm2, %v1008_v29  ;;  %v647_v29 = vmul.f32 %v1423_v27, %v631_v57  ;;  %v1045_v57 = vld [vmem:[#allocation2 + $0x48] sm:$0xff] }
 0x36c   :  { %v795_v48 = vpop.xlane.xlu0 %794 }
 0x36d   :  { %v817_v17 = vadd.f32 %v795_v48, %v641_v40 }
 0x36f   :  { %834 = vst.msk [vmem:[#allocation3 + $0x48] sm:$0xff] %vm24_vm2, %v817_v17 }
 0x370   :  { %v777_v44 = vpop.xlane.xlu0 %776 }
 0x371   :  { %v808_v61 = vadd.f32 %v777_v44, %v632_v43  ;;  %v1039_v44 = vld [vmem:[#allocation2 + $0x18] sm:$0xff] }
 0x373   :  { %825 = vst.msk [vmem:[#allocation3] sm:$0xff] %vm24_vm2, %v808_v61 }
 0x374   :  { %v783_v11 = vpop.xlane.xlu0 %782 }
 0x375   :  { %v811_v1 = vadd.f32 %v783_v11, %v635_v32  ;;  %v1064_v11 = vld [vmem:[#allocation3 + $0x60] sm:$0xff] }
 0x376   :  { %v1061_v7 = vld [vmem:[#allocation3 + $0x48] sm:$0xff] }
 0x377   :  { %828 = vst.msk [vmem:[#allocation3 + $0x18] sm:$0xff] %vm24_vm2, %v811_v1  ;;  %v866_v1 = vld [vmem:[#allocation4 + $0x48] sm:$0xff] }
 0x378   :  { %v799_v10 = vpop.xlane.xlu0 %798 }
 0x379   :  { %v819_v58 = vadd.f32 %v799_v10, %v643_v28 }
 0x37a   :  { %v1052_v24 = vld [vmem:[#allocation3] sm:$0xff] }
 0x37b   :  { %1424 = vlog2.f32 %v1052_v24  ;;  %836 = vst.msk [vmem:[#allocation3 + $0x58] sm:$0xff] %vm24_vm2, %v819_v58  ;;  %v1038_v58 = vld [vmem:[#allocation2 + $0x10] sm:$0xff] }
 0x37c   :  { %v781_v9 = vpop.xlane.xlu0 %780  ;;  %1426 = vpow2.f32 %v596_v46 }
 0x37d   :  { %v810_v38 = vadd.f32 %v781_v9, %v634_v55  ;;  %1428 = vpow2.f32 %v612_v20  ;;  %v867_v20 = vld [vmem:[#allocation4 + $0x50] sm:$0xff] }
 0x37e   :  { %v1055_v47 = vld [vmem:[#allocation3 + $0x18] sm:$0xff] }
 0x37f   :  { %1430 = vlog2.f32 %v1055_v47  ;;  %827 = vst.msk [vmem:[#allocation3 + $0x10] sm:$0xff] %vm24_vm2, %v810_v38 }
 0x380   :  { %v803_v2 = vpop.xlane.xlu0 %802 }
 0x381   :  { %v821_v21 = vadd.f32 %v803_v2, %v645_v42 }
 0x382   :  { %v1063_v17 = vld [vmem:[#allocation3 + $0x58] sm:$0xff] }
 0x383   :  { %838 = vst.msk [vmem:[#allocation3 + $0x68] sm:$0xff] %vm24_vm2, %v821_v21  ;;  %v870_v21 = vld [vmem:[#allocation4 + $0x68] sm:$0xff] }
 0x384   :  { %v791_v13 = vpop.xlane.xlu0 %790 }
 0x385   :  { %v1425_v0 = vpop.eup %1424  ;;  %v815_v19 = vadd.f32 %v791_v13, %v639_v18  ;;  %v869_v13 = vld [vmem:[#allocation4 + $0x60] sm:$0xff] }
 0x386   :  { %v1069_v12 = vmul.f32 0.6931472, %v1425_v0  ;;  %v1054_v25 = vld [vmem:[#allocation3 + $0x10] sm:$0xff]  ;;  %v1427_v53 = vpop.eup %1426 }
 0x387   :  { %1432 = vlog2.f32 %v1054_v25  ;;  %832 = vst.msk [vmem:[#allocation3 + $0x38] sm:$0xff] %vm24_vm2, %v815_v19  ;;  %v1429_v31 = vpop.eup %1428  ;;  %v638_v49 = vmul.f32 %v1427_v53, %v622_v41  ;;  %v1044_v19 = vld [vmem:[#allocation2 + $0x40] sm:$0xff] }
 0x388   :  { %1434 = vlog2.f32 %v1061_v7  ;;  %v1100_v37 = vadd.f32 %v1069_v12, %v1036_v23  ;;  %v807_v40 = vpop.xlane.xlu0 %806  ;;  %v646_v56 = vmul.f32 %v1429_v31, %v630_v59 }
 0x389   :  { %v1431_v48 = vpop.eup %1430  ;;  %1436 = vlog2.f32 %v1060_v51  ;;  %v823_v50 = vadd.f32 %v807_v40, %v647_v29 }
 0x38a   :  { %v1132_v43 = vsub.f32 %v1100_v37, %v1116_v33  ;;  %v1075_v22 = vmul.f32 0.6931472, %v1431_v48  ;;  %1438 = vlog2.f32 %v1063_v17  ;;  %v1065_v54 = vld [vmem:[#allocation3 + $0x68] sm:$0xff]  ;;  %v872_v48 = vld [vmem:[#allocation4 + $0x78] sm:$0xff] }
 0x38b   :  { %840 = vst.msk [vmem:[#allocation3 + $0x78] sm:$0xff] %vm24_vm2, %v823_v50  ;;  %1440 = vlog2.f32 %v1062_v15  ;;  %v1043_v17 = vld [vmem:[#allocation2 + $0x38] sm:$0xff]  ;;  %v871_v15 = vld [vmem:[#allocation4 + $0x70] sm:$0xff] }
 0x38c   :  { %1148 = vst.msk [vmem:[%s2325_s5] sm:$0xff] %vm24_vm2, %v1132_v43  ;;  %v1103_v61 = vadd.f32 %v1075_v22, %v1039_v44  ;;  %v789_v6 = vpop.xlane.xlu0 %788  ;;  %v1047_v43 = vld [vmem:[#allocation2 + $0x58] sm:$0xff] }
 0x38d   :  { %v814_v32 = vadd.f32 %v789_v6, %v638_v49  ;;  %v805_v30 = vpop.xlane.xlu1 %804  ;;  %v1123_v6 = vld [vmem:[#allocation4 + $0x38] sm:$0xff] }
 0x38e   :  { %v1135_v36 = vsub.f32 %v1103_v61, %v1119_v63  ;;  %v1059_v35 = vld [vmem:[#allocation3 + $0x38] sm:$0xff]  ;;  %v822_v4 = vadd.f32 %v805_v30, %v646_v56  ;;  %v1046_v61 = vld [vmem:[#allocation2 + $0x50] sm:$0xff] }
 0x38f   :  { %1442 = vlog2.f32 %v1059_v35  ;;  %831 = vst.msk [vmem:[#allocation3 + $0x30] sm:$0xff] %vm24_vm2, %v814_v32 }
 0x390   :  { %1151 = vst.msk [vmem:[%s2325_s5 + $0x18] sm:$0xff] %vm24_vm2, %v1135_v36  ;;  %1444 = vlog2.f32 %v1065_v54  ;;  %839 = vst.msk [vmem:[#allocation3 + $0x70] sm:$0xff] %vm24_vm2, %v822_v4  ;;  %v988_v60 = vpop.xlane.xlu0 %987 }
 0x391   :  { %v1433_v5 = vpop.eup %1432  ;;  %1446 = vlog2.f32 %v1064_v11  ;;  %v1010_v45 = vadd.f32 %v988_v60, %v866_v1  ;;  %v986_v26 = vpop.xlane.xlu1 %985 }
 0x392   :  { %v1435_v3 = vpop.eup %1434  ;;  %v1073_v28 = vmul.f32 0.6931472, %v1433_v5  ;;  %v1067_v39 = vld [vmem:[#allocation3 + $0x78] sm:$0xff]  ;;  %v1009_v10 = vadd.f32 %v986_v26, %v865_v62  ;;  %v1049_v5 = vld [vmem:[#allocation2 + $0x68] sm:$0xff] }
 0x393   :  { %v1437_v46 = vpop.eup %1436  ;;  %1026 = vst.msk [vmem:[#allocation4 + $0x48] sm:$0xff] %vm24_vm2, %v1010_v45  ;;  %1448 = vlog2.f32 %v1067_v39  ;;  %v1087_v9 = vmul.f32 0.6931472, %v1435_v3  ;;  %v1048_v3 = vld [vmem:[#allocation2 + $0x60] sm:$0xff] }
 0x394   :  { %v1102_v24 = vadd.f32 %v1073_v28, %v1038_v58  ;;  %1025 = vst.msk [vmem:[#allocation4 + $0x40] sm:$0xff] %vm24_vm2, %v1009_v10  ;;  %v992_v55 = vpop.xlane.xlu0 %991  ;;  %v1439_v47 = vpop.eup %1438  ;;  %v1085_v2 = vmul.f32 0.6931472, %v1437_v46 }
 0x395   :  { %v1012_v16 = vadd.f32 %v992_v55, %v868_v34  ;;  %v990_v38 = vpop.xlane.xlu1 %989  ;;  %v1441_v18 = vpop.eup %1440  ;;  %v1109_v51 = vadd.f32 %v1087_v9, %v1045_v57  ;;  %v1091_v12 = vmul.f32 0.6931472, %v1439_v47  ;;  %v1050_v9 = vld [vmem:[#allocation2 + $0x70] sm:$0xff] }
 0x396   :  { %v1134_v42 = vsub.f32 %v1102_v24, %v1118_v52  ;;  %v1058_v14 = vld [vmem:[#allocation3 + $0x30] sm:$0xff]  ;;  %v1011_v8 = vadd.f32 %v990_v38, %v867_v20  ;;  %v1108_v37 = vadd.f32 %v1085_v2, %v1044_v19  ;;  %v1089_v40 = vmul.f32 0.6931472, %v1441_v18 }
 0x397   :  { %1450 = vlog2.f32 %v1058_v14  ;;  %v1066_v27 = vld [vmem:[#allocation3 + $0x70] sm:$0xff]  ;;  %1028 = vst.msk [vmem:[#allocation4 + $0x58] sm:$0xff] %vm24_vm2, %v1012_v16  ;;  %v1111_v56 = vadd.f32 %v1091_v12, %v1047_v43  ;;  %v1051_v16 = vld [vmem:[#allocation2 + $0x78] sm:$0xff] }
 0x398   :  { %1150 = vst.msk [vmem:[%s2325_s5 + $0x10] sm:$0xff] %vm24_vm2, %v1134_v42  ;;  %1452 = vlog2.f32 %v1066_v27  ;;  %1027 = vst.msk [vmem:[#allocation4 + $0x50] sm:$0xff] %vm24_vm2, %v1011_v8  ;;  %v996_v0 = vpop.xlane.xlu0 %995  ;;  %v1110_v35 = vadd.f32 %v1089_v40, %v1046_v61  ;;  %v1042_v20 = vld [vmem:[#allocation2 + $0x30] sm:$0xff] }
 0x399   :  { %v1443_v7 = vpop.eup %1442  ;;  %v1014_v25 = vadd.f32 %v996_v0, %v870_v21  ;;  %v994_v53 = vpop.xlane.xlu1 %993  ;;  %v1122_v42 = vld [vmem:[#allocation4 + $0x30] sm:$0xff] }
 0x39a   :  { %v1445_v23 = vpop.eup %1444  ;;  %v1083_v29 = vmul.f32 0.6931472, %v1443_v7  ;;  %v1125_v31 = vld [vmem:[#allocation4 + $0x48] sm:$0xff]  ;;  %v1013_v41 = vadd.f32 %v994_v53, %v869_v13 }
 0x39b   :  { %v1447_v33 = vpop.eup %1446  ;;  %v1141_v50 = vsub.f32 %v1109_v51, %v1125_v31  ;;  %v1124_v59 = vld [vmem:[#allocation4 + $0x40] sm:$0xff]  ;;  %1030 = vst.msk [vmem:[#allocation4 + $0x68] sm:$0xff] %vm24_vm2, %v1014_v25  ;;  %v1095_v63 = vmul.f32 0.6931472, %v1445_v23 }
 0x39c   :  { %v1107_v22 = vadd.f32 %v1083_v29, %v1043_v17  ;;  %v1140_v44 = vsub.f32 %v1108_v37, %v1124_v59  ;;  %1029 = vst.msk [vmem:[#allocation4 + $0x60] sm:$0xff] %vm24_vm2, %v1013_v41  ;;  %v1000_v49 = vpop.xlane.xlu0 %999  ;;  %v1093_v4 = vmul.f32 0.6931472, %v1447_v33 }
 0x39d   :  { %1157 = vst.msk [vmem:[%s2325_s5 + $0x48] sm:$0xff] %vm24_vm2, %v1141_v50  ;;  %v1016_v54 = vadd.f32 %v1000_v49, %v872_v48  ;;  %v998_v32 = vpop.xlane.xlu1 %997  ;;  %v1449_v30 = vpop.eup %1448  ;;  %v1113_v28 = vadd.f32 %v1095_v63, %v1049_v5 }
 0x39e   :  { %v1139_v11 = vsub.f32 %v1107_v22, %v1123_v6  ;;  %1156 = vst.msk [vmem:[%s2325_s5 + $0x40] sm:$0xff] %vm24_vm2, %v1140_v44  ;;  %v1127_v36 = vld [vmem:[#allocation4 + $0x58] sm:$0xff]  ;;  %v1015_v1 = vadd.f32 %v998_v32, %v871_v15  ;;  %v1099_v39 = vmul.f32 0.6931472, %v1449_v30  ;;  %v1112_v58 = vadd.f32 %v1093_v4, %v1048_v3 }
 0x39f   :  { %v1143_v62 = vsub.f32 %v1111_v56, %v1127_v36  ;;  %v1126_v60 = vld [vmem:[#allocation4 + $0x50] sm:$0xff]  ;;  %1032 = vst.msk [vmem:[#allocation4 + $0x78] sm:$0xff] %vm24_vm2, %v1016_v54 }
 0x3a0   :  { %1155 = vst.msk [vmem:[%s2325_s5 + $0x38] sm:$0xff] %vm24_vm2, %v1139_v11  ;;  %v1142_v45 = vsub.f32 %v1110_v35, %v1126_v60  ;;  %1031 = vst.msk [vmem:[#allocation4 + $0x70] sm:$0xff] %vm24_vm2, %v1015_v1  ;;  %v1115_v14 = vadd.f32 %v1099_v39, %v1051_v16 }
 0x3a1   :  { %v1451_v26 = vpop.eup %1450  ;;  %1159 = vst.msk [vmem:[%s2325_s5 + $0x58] sm:$0xff] %vm24_vm2, %v1143_v62 }
 0x3a2   :  { %v1453_v10 = vpop.eup %1452  ;;  %v1081_v34 = vmul.f32 0.6931472, %v1451_v26  ;;  %1158 = vst.msk [vmem:[%s2325_s5 + $0x50] sm:$0xff] %vm24_vm2, %v1142_v45  ;;  %v1129_v46 = vld [vmem:[#allocation4 + $0x68] sm:$0xff] }
 0x3a3   :  { %v1145_v24 = vsub.f32 %v1113_v28, %v1129_v46  ;;  %v1128_v55 = vld [vmem:[#allocation4 + $0x60] sm:$0xff]  ;;  %v1097_v52 = vmul.f32 0.6931472, %v1453_v10 }
 0x3a4   :  { %v1106_v38 = vadd.f32 %v1081_v34, %v1042_v20  ;;  %v1144_v47 = vsub.f32 %v1112_v58, %v1128_v55 }
 0x3a5   :  { %1161 = vst.msk [vmem:[%s2325_s5 + $0x68] sm:$0xff] %vm24_vm2, %v1145_v24  ;;  %v1114_v2 = vadd.f32 %v1097_v52, %v1050_v9 }
 0x3a6   :  { %v1138_v8 = vsub.f32 %v1106_v38, %v1122_v42  ;;  %1160 = vst.msk [vmem:[%s2325_s5 + $0x60] sm:$0xff] %vm24_vm2, %v1144_v47  ;;  %v1131_v21 = vld [vmem:[#allocation4 + $0x78] sm:$0xff] }
 0x3a7   :  { %v1147_v18 = vsub.f32 %v1115_v14, %v1131_v21  ;;  %v1130_v27 = vld [vmem:[#allocation4 + $0x70] sm:$0xff] }
 0x3a8   :  { %1154 = vst.msk [vmem:[%s2325_s5 + $0x30] sm:$0xff] %vm24_vm2, %v1138_v8  ;;  %v1146_v13 = vsub.f32 %v1114_v2, %v1130_v27 }
 0x3a9   :  { %1163 = vst.msk [vmem:[%s2325_s5 + $0x78] sm:$0xff] %vm24_vm2, %v1147_v18 }
 0x3aa   :  { %1162 = vst.msk [vmem:[%s2325_s5 + $0x70] sm:$0xff] %vm24_vm2, %v1146_v13 }

</bundles_post_ra>
